<compile_context>
chip_gen: v7x
topology: tpu7x:2x2x1
jax: 0.10.0
libtpu: 0.0.40
codegen_flags: <defaults>
</compile_context>

<pallas_src>
import jax
import jax.numpy as jnp
from jax.experimental import pallas as pl
from jax.experimental.pallas import tpu as pltpu

ALPHA = 0.01


def make_kernel(D, H, G):
    """Kernel closure over static sizes. G examples are packed per row."""
    GH = G * H          # lanes per hidden group (h-group / a-group)
    GD = G * D          # lanes per output group (= 128 by construction)

    def kernel(x_ref, p1_ref, p2_ref, s_ref, out_ref):
        x = x_ref[...]                                   # (rt, 128) f32, lane-dense

        # --- packed parameters (resident in VMEM, constant index map) -------
        W1 = p1_ref[:GD, :]                              # (128, 2GH) block-diag [W1f | W1v]
        b1 = p1_ref[GD:GD + 1, :]                        # (1, 2GH)
        W2a = p2_ref[:2 * GH, :]                         # (2GH, 3GD)  h->fx, a->alpha*Vx
        W2b = p2_ref[2 * GH:3 * GH, :]                   # (GH, 3GD)   (1-a^2)->gV (w2v folded)
        b2 = p2_ref[3 * GH:3 * GH + 1, :]                # (1, 3GD)
        S = s_ref[...]                                   # (128, 128) segment-sum-broadcast

        # --- fused first layers of fhat and V: one full-width MXU pass ------
        hz = jnp.tanh(jnp.dot(x, W1, preferred_element_type=jnp.float32) + b1)  # (rt, 2GH)
        a = hz[:, GH:]                                   # (rt, GH) V-hidden, 128-aligned slice
        dz = 1.0 - a * a                                 # only the a-half (no zero matmul rows)

        # --- fused second layers + Vx readout ------------------------------
        # out2[:, :GD]      = fx   (per-example groups of D lanes)
        # out2[:, GD:2GD]   = gV
        # out2[:, 2GD:3GD]  = alpha*V(x) broadcast across each example's D lanes
        out2 = (jnp.dot(hz, W2a, preferred_element_type=jnp.float32)
                + jnp.dot(dz, W2b, preferred_element_type=jnp.float32)
                + b2)                                    # (rt, 3GD)

        fx = out2[:, :GD]                                # 128-aligned whole-vreg slices
        gV = out2[:, GD:2 * GD]
        aVx = out2[:, 2 * GD:3 * GD]

        # --- stability projection --------------------------------------------
        # S sums within each example's D-lane group and broadcasts the result
        # back across that group (MXU; no cross-lane XLU work).
        num = jnp.maximum(
            jnp.dot(gV * fx, S, preferred_element_type=jnp.float32) + aVx, 0.0)
        den = jnp.dot(gV * gV, S, preferred_element_type=jnp.float32)
        coef = jnp.where(num > 0.0, num / jnp.maximum(den, 1e-12), 0.0)  # 0/0 -> 0

        out_ref[...] = (fx - gV * coef).astype(out_ref.dtype)           # dense 128-lane store

    return kernel


def pack_params(params, D, H, G, alpha):
    """One-time wrapper-side packing: block-diagonal, lane-dense weights."""
    (w1f, b1f, w2f, b2f, w1v, b1v, w2v, b2v) = params
    GH, GD = G * H, G * D
    nout = 3 * GD

    # ---- layer 1: (G*D, 2*G*H) block-diagonal, columns [h_all | a_all] -----
    W1 = jnp.zeros((GD, 2 * GH), jnp.float32)
    b1 = jnp.zeros((1, 2 * GH), jnp.float32)
    for e in range(G):
        W1 = W1.at[e * D:(e + 1) * D, e * H:(e + 1) * H].set(w1f)
        W1 = W1.at[e * D:(e + 1) * D, GH + e * H:GH + (e + 1) * H].set(w1v)
        b1 = b1.at[:, e * H:(e + 1) * H].set(b1f)
        b1 = b1.at[:, GH + e * H:GH + (e + 1) * H].set(b1v)
    p1 = jnp.concatenate([W1, b1], axis=0)               # (G*D + 1, 2*G*H)

    # ---- layer 2: hz -> [fx | . | alpha*Vx], dz_a -> [. | gV | .] ----------
    gv_w = (w2v.T * w1v.T).astype(jnp.float32)           # (H, D): w2v folded into grad
    vx_w = (alpha * jnp.tile(w2v.T, (1, D))).astype(jnp.float32)  # (H, D): Vx pre-broadcast
    W2a = jnp.zeros((2 * GH, nout), jnp.float32)
    W2b = jnp.zeros((GH, nout), jnp.float32)
    b2 = jnp.zeros((1, nout), jnp.float32)
    for e in range(G):
        W2a = W2a.at[e * H:(e + 1) * H, e * D:(e + 1) * D].set(w2f)
        W2a = W2a.at[GH + e * H:GH + (e + 1) * H,
                     2 * GD + e * D:2 * GD + (e + 1) * D].set(vx_w)
        W2b = W2b.at[e * H:(e + 1) * H, GD + e * D:GD + (e + 1) * D].set(gv_w)
        b2 = b2.at[:, e * D:(e + 1) * D].set(b2f)
        b2 = b2.at[:, 2 * GD + e * D:2 * GD + (e + 1) * D].set(alpha * b2v)
    p2 = jnp.concatenate([W2a, W2b, b2], axis=0)         # (3*G*H + 1, 3*G*D)

    # ---- segment-sum-broadcast matrix: blocks of ones of size (D, D) -------
    S = jnp.kron(jnp.eye(G, dtype=jnp.float32), jnp.ones((D, D), jnp.float32))
    return p1, p2, S


def dynamics_forward(x, params, *, block_rows=1024, alpha=ALPHA):
    B, D = x.shape
    H = params[0].shape[1]
    assert 128 % D == 0, "lane-dense packing requires D to divide 128"
    G = 128 // D                                  # examples packed per 128-lane row
    p1, p2, S = pack_params(params, D, H, G, alpha)

    def rup(a, m):
        return -(-a // m) * m

    rows = -(-B // G)                             # packed rows needed
    rows8 = rup(rows, 8)                          # sublane-aligned
    rt = min(block_rows, rows8)                   # batch tile (rows), multiple of 8
    if rows8 >= 16:
        # keep >= 2 grid steps so the "parallel" axis can shard across v7x's 2 TCs
        rt = min(rt, max(8, rup(rows8 // 2, 8)))
    Br = rup(rows8, rt)
    Bp = Br * G

    xp = x if Bp == B else jnp.pad(x, ((0, Bp - B), (0, 0)))
    xpk = xp.reshape(Br, G * D)                   # free row-major reshape -> (rows, 128)

    grid = (Br // rt,)
    out = pl.pallas_call(
        make_kernel(D, H, G),
        out_shape=jax.ShapeDtypeStruct((Br, G * D), jnp.float32),
        grid=grid,
        in_specs=[
            pl.BlockSpec((rt, G * D), lambda i: (i, 0)),   # x: tiled over packed rows
            pl.BlockSpec(p1.shape, lambda i: (0, 0)),      # layer-1 weights (resident)
            pl.BlockSpec(p2.shape, lambda i: (0, 0)),      # layer-2 weights (resident)
            pl.BlockSpec(S.shape, lambda i: (0, 0)),       # segment-sum matrix (resident)
        ],
        out_specs=pl.BlockSpec((rt, G * D), lambda i: (i, 0)),
        compiler_params=pltpu.CompilerParams(
            dimension_semantics=("parallel",),             # megacore-shardable batch axis
            vmem_limit_bytes=32 * 1024 * 1024,             # safe on v5e/v6e/v7x
        ),
    )(xpk, p1, p2, S)

    out = out.reshape(Bp, D)                      # free reshape back to (examples, D)
    return out[:B] if Bp != B else out


def dynamics_reference(x, params):
    """Pure-JAX reference of the same math (unfused params)."""
    (w1f, b1f, w2f, b2f, w1v, b1v, w2v, b2v) = params
    h = jnp.tanh(x @ w1f + b1f)
    fx = h @ w2f + b2f
    a = jnp.tanh(x @ w1v + b1v)
    Vx = jnp.sum(a * w2v, axis=1, keepdims=True) + b2v
    gV = ((1.0 - a * a) * w2v) @ w1v.T
    num = jnp.maximum(jnp.sum(gV * fx, axis=1, keepdims=True) + ALPHA * Vx, 0.0)
    den = jnp.maximum(jnp.sum(gV * gV, axis=1, keepdims=True), 1e-12)
    return fx - gV * (num / den)


def make_params(key, D, H):
    ks = jax.random.split(key, 8)
    s_in = 1.0 / jnp.sqrt(D)
    s_h = 1.0 / jnp.sqrt(H)
    w1f = jax.random.uniform(ks[0], (D, H), jnp.float32, -s_in, s_in)
    b1f = jax.random.uniform(ks[1], (1, H), jnp.float32, -s_in, s_in)
    w2f = jax.random.uniform(ks[2], (H, D), jnp.float32, -s_h, s_h)
    b2f = jax.random.uniform(ks[3], (1, D), jnp.float32, -s_h, s_h)
    w1v = jax.random.uniform(ks[4], (D, H), jnp.float32, -s_in, s_in)
    b1v = jax.random.uniform(ks[5], (1, H), jnp.float32, -s_in, s_in)
    w2v = jax.random.uniform(ks[6], (1, H), jnp.float32, -s_h, s_h)
    b2v = jax.random.uniform(ks[7], (1, 1), jnp.float32, -s_h, s_h)
    return (w1f, b1f, w2f, b2f, w1v, b1v, w2v, b2v)


if __name__ == "__main__":
    # Small shapes consistent with the module. B=256 -> 32 packed rows -> a
    # 2-step "parallel" grid, exercising the tiled/pipelined path.
    B, D, H = 256, 16, 32
    key = jax.random.PRNGKey(0)
    kx, kp = jax.random.split(key)
    x = jax.random.normal(kx, (B, D), jnp.float32)
    params = make_params(kp, D, H)

    rv = jax.block_until_ready(dynamics_forward(x, params))
    rv_ref = dynamics_reference(x, params)
    assert rv.shape == (B, D)
    assert bool(jnp.all(jnp.isfinite(rv)))
    assert bool(jnp.allclose(rv, rv_ref, atol=2e-3, rtol=2e-3)), (
        "Pallas kernel disagrees with JAX reference")

    # Ragged batch exercises the pad-to-row / pad-to-tile / slice-back path.
    x2 = x[:50]
    rv2 = jax.block_until_ready(dynamics_forward(x2, params))
    rv2_ref = dynamics_reference(x2, params)
    assert rv2.shape == (50, D)
    assert bool(jnp.all(jnp.isfinite(rv2)))
    assert bool(jnp.allclose(rv2, rv2_ref, atol=2e-3, rtol=2e-3)), (
        "Pallas kernel (padded batch) disagrees with JAX reference")

    print("KERNEL_OK")
</pallas_src>

<mosaic_0001>
module attributes {stable_mosaic.version = 11 : i64} {
  func.func @kernel(%arg0: i32, %arg1: memref<16x128xf32, #tpu.memory_space<vmem>>, %arg2: memref<129x512xf32, #tpu.memory_space<vmem>>, %arg3: memref<769x384xf32, #tpu.memory_space<vmem>>, %arg4: memref<128x128xf32, #tpu.memory_space<vmem>>, %arg5: memref<16x128xf32, #tpu.memory_space<vmem>>) attributes {dimension_semantics = [#tpu.dimension_semantics<parallel>], iteration_bounds = array<i64: 2>, scalar_prefetch = 0 : i64, scratch_operands = 0 : i64, tpu.core_type = #tpu.core_type<tc>, window_params = [{transform_indices = @transform_0, window_bounds = array<i64: 16, 128>}, {pipeline_mode = #tpu.pipeline_mode<synchronous>, transform_indices = @transform_1, window_bounds = array<i64: 129, 512>}, {pipeline_mode = #tpu.pipeline_mode<synchronous>, transform_indices = @transform_2, window_bounds = array<i64: 769, 384>}, {pipeline_mode = #tpu.pipeline_mode<synchronous>, transform_indices = @transform_3, window_bounds = array<i64: 128, 128>}, {transform_indices = @transform_4, window_bounds = array<i64: 16, 128>}]} {
    %c0 = arith.constant 0 : index
    %c0_0 = arith.constant 0 : index
    %0 = vector.load %arg1[%c0, %c0_0] : memref<16x128xf32, #tpu.memory_space<vmem>>, vector<16x128xf32>
    %c0_1 = arith.constant 0 : index
    %c0_2 = arith.constant 0 : index
    %1 = vector.load %arg2[%c0_1, %c0_2] : memref<129x512xf32, #tpu.memory_space<vmem>>, vector<128x512xf32>
    %c128 = arith.constant 128 : index
    %c0_3 = arith.constant 0 : index
    %2 = vector.load %arg2[%c128, %c0_3] : memref<129x512xf32, #tpu.memory_space<vmem>>, vector<1x512xf32>
    %c0_4 = arith.constant 0 : index
    %c0_5 = arith.constant 0 : index
    %3 = vector.load %arg3[%c0_4, %c0_5] : memref<769x384xf32, #tpu.memory_space<vmem>>, vector<512x384xf32>
    %c512 = arith.constant 512 : index
    %c0_6 = arith.constant 0 : index
    %4 = vector.load %arg3[%c512, %c0_6] : memref<769x384xf32, #tpu.memory_space<vmem>>, vector<256x384xf32>
    %c768 = arith.constant 768 : index
    %c0_7 = arith.constant 0 : index
    %5 = vector.load %arg3[%c768, %c0_7] : memref<769x384xf32, #tpu.memory_space<vmem>>, vector<1x384xf32>
    %c0_8 = arith.constant 0 : index
    %c0_9 = arith.constant 0 : index
    %6 = vector.load %arg4[%c0_8, %c0_9] : memref<128x128xf32, #tpu.memory_space<vmem>>, vector<128x128xf32>
    %cst = arith.constant dense<0.000000e+00> : vector<16x512xf32>
    %7 = tpu.matmul %0, %1, %cst {dimension_numbers = #tpu.dot_dimension_numbers<[1], [0], [0], [1], [0, 0, 1, 1], [], []>} : vector<16x128xf32>, vector<128x512xf32>, vector<16x512xf32> -> vector<16x512xf32>
    %8 = vector.broadcast %2 : vector<1x512xf32> to vector<16x512xf32>
    %9 = arith.addf %7, %8 : vector<16x512xf32>
    %10 = math.tanh %9 : vector<16x512xf32>
    %11 = vector.extract_strided_slice %10 {offsets = [0, 256], sizes = [16, 256], strides = [1, 1]} : vector<16x512xf32> to vector<16x256xf32>
    %12 = arith.mulf %11, %11 : vector<16x256xf32>
    %cst_10 = arith.constant 1.000000e+00 : f32
    %13 = vector.broadcast %cst_10 : f32 to vector<16x256xf32>
    %14 = arith.subf %13, %12 : vector<16x256xf32>
    %cst_11 = arith.constant dense<0.000000e+00> : vector<16x384xf32>
    %15 = tpu.matmul %10, %3, %cst_11 {dimension_numbers = #tpu.dot_dimension_numbers<[1], [0], [0], [1], [0, 0, 1, 1], [], []>} : vector<16x512xf32>, vector<512x384xf32>, vector<16x384xf32> -> vector<16x384xf32>
    %cst_12 = arith.constant dense<0.000000e+00> : vector<16x384xf32>
    %16 = tpu.matmul %14, %4, %cst_12 {dimension_numbers = #tpu.dot_dimension_numbers<[1], [0], [0], [1], [0, 0, 1, 1], [], []>} : vector<16x256xf32>, vector<256x384xf32>, vector<16x384xf32> -> vector<16x384xf32>
    %17 = arith.addf %15, %16 : vector<16x384xf32>
    %18 = vector.broadcast %5 : vector<1x384xf32> to vector<16x384xf32>
    %19 = arith.addf %17, %18 : vector<16x384xf32>
    %20 = vector.extract_strided_slice %19 {offsets = [0, 0], sizes = [16, 128], strides = [1, 1]} : vector<16x384xf32> to vector<16x128xf32>
    %21 = vector.extract_strided_slice %19 {offsets = [0, 128], sizes = [16, 128], strides = [1, 1]} : vector<16x384xf32> to vector<16x128xf32>
    %22 = vector.extract_strided_slice %19 {offsets = [0, 256], sizes = [16, 128], strides = [1, 1]} : vector<16x384xf32> to vector<16x128xf32>
    %23 = arith.mulf %21, %20 : vector<16x128xf32>
    %cst_13 = arith.constant dense<0.000000e+00> : vector<16x128xf32>
    %24 = tpu.matmul %23, %6, %cst_13 {dimension_numbers = #tpu.dot_dimension_numbers<[1], [0], [0], [1], [0, 0, 1, 1], [], []>} : vector<16x128xf32>, vector<128x128xf32>, vector<16x128xf32> -> vector<16x128xf32>
    %25 = arith.addf %24, %22 : vector<16x128xf32>
    %cst_14 = arith.constant 0.000000e+00 : f32
    %26 = vector.broadcast %cst_14 : f32 to vector<16x128xf32>
    %27 = arith.maximumf %25, %26 : vector<16x128xf32>
    %28 = arith.mulf %21, %21 : vector<16x128xf32>
    %cst_15 = arith.constant dense<0.000000e+00> : vector<16x128xf32>
    %29 = tpu.matmul %28, %6, %cst_15 {dimension_numbers = #tpu.dot_dimension_numbers<[1], [0], [0], [1], [0, 0, 1, 1], [], []>} : vector<16x128xf32>, vector<128x128xf32>, vector<16x128xf32> -> vector<16x128xf32>
    %cst_16 = arith.constant 0.000000e+00 : f32
    %30 = vector.broadcast %cst_16 : f32 to vector<16x128xf32>
    %31 = arith.cmpf ogt, %27, %30 : vector<16x128xf32>
    %cst_17 = arith.constant 9.99999996E-13 : f32
    %32 = vector.broadcast %cst_17 : f32 to vector<16x128xf32>
    %33 = arith.maximumf %29, %32 : vector<16x128xf32>
    %34 = arith.divf %27, %33 : vector<16x128xf32>
    %cst_18 = arith.constant 0.000000e+00 : f32
    %35 = vector.broadcast %cst_18 : f32 to vector<16x128xf32>
    %36 = arith.select %31, %34, %35 : vector<16x128xi1>, vector<16x128xf32>
    %37 = arith.mulf %21, %36 : vector<16x128xf32>
    %38 = arith.subf %20, %37 : vector<16x128xf32>
    %c0_19 = arith.constant 0 : index
    %c0_20 = arith.constant 0 : index
    %39 = vector.load %arg5[%c0_19, %c0_20] : memref<16x128xf32, #tpu.memory_space<vmem>>, vector<16x128xf32>
    tpu.vector_store %arg5[%c0_19, %c0_20], %38 {strides = array<i32>} : memref<16x128xf32, #tpu.memory_space<vmem>>, vector<16x128xf32>,
    return
  }
  func.func @transform_0(%arg0: i32) -> (i32, i32) {
    %c0_i32 = arith.constant 0 : i32
    %c0_i32_0 = arith.constant 0 : i32
    return %arg0, %c0_i32 : i32, i32
  }
  func.func @transform_1(%arg0: i32) -> (i32, i32) {
    %c0_i32 = arith.constant 0 : i32
    %c0_i32_0 = arith.constant 0 : i32
    %c0_i32_1 = arith.constant 0 : i32
    return %c0_i32, %c0_i32_0 : i32, i32
  }
  func.func @transform_2(%arg0: i32) -> (i32, i32) {
    %c0_i32 = arith.constant 0 : i32
    %c0_i32_0 = arith.constant 0 : i32
    %c0_i32_1 = arith.constant 0 : i32
    return %c0_i32, %c0_i32_0 : i32, i32
  }
  func.func @transform_3(%arg0: i32) -> (i32, i32) {
    %c0_i32 = arith.constant 0 : i32
    %c0_i32_0 = arith.constant 0 : i32
    %c0_i32_1 = arith.constant 0 : i32
    return %c0_i32, %c0_i32_0 : i32, i32
  }
  func.func @transform_4(%arg0: i32) -> (i32, i32) {
    %c0_i32 = arith.constant 0 : i32
    %c0_i32_0 = arith.constant 0 : i32
    return %arg0, %c0_i32 : i32, i32
  }
}

</mosaic_0001>

<bundles_post_ra>
// kernel: tpu_custom_call.1
= control target key start
LH: loop header
LB: loop body
LE: loop exit
PB: predicated region body
PF: predicated region fallthrough
CT: control target
= control target key end

     0   :  { %9 = vsyncpa [#allocation3], 0  ;;  %s2981_s0 = inlined_call_operand.hbm [shape: f32[32,128], index: 0, kind: input, shape index: {}]   ;;  %s2982_s1 = inlined_call_operand.hbm [shape: f32[129,512], index: 1, kind: input, shape index: {}]   ;;  %s2983_s2 = inlined_call_operand.hbm [shape: f32[769,384], index: 2, kind: input, shape index: {}]   ;;  %s2984_s3 = inlined_call_operand.hbm [shape: f32[128,128], index: 3, kind: input, shape index: {}]   ;;  %s2985_s4 = inlined_call_operand.hbm [shape: f32[32,128], index: 4, kind: output, shape index: {}]  }
   0x1   :  { %11 = vsyncpa [#allocation3 + $0x1], 0 }
   0x2   :  { %12 = vsyncpa [#allocation6], 0 }
   0x3   :  { %13 = vsyncpa [#allocation9], 0 }
   0x4   :  { %14 = vsyncpa [#allocation4], 0 }
   0x5   :  { %16 = vsyncpa [#allocation4 + $0x1], 0  ;;  %s2594_s15 = smov 0   ;;  %s2596_s16 = smov 0  }
   0x6   :  { %s2598_s17 = smov 0   ;;  %s2600_s18 = smov 0  }
   0x7 LB: > { %s2615_s19 = sadd.s32 4294967295, %s2553_s18   ;;  %s1593_s20 = sadd.s32 4294967294, %s2553_s18   ;;  %s2553_s18 = sphi %s2600_s18, %s3008_s18   ;;  %s2549_s17 = sphi %s2598_s17, %s3007_s17   ;;  %s2545_s16 = sphi %s2596_s16, %s3006_s16   ;;  %s2541_s15 = sphi %s2594_s15, %s3005_s15  }
   0x8   : > { %p42_p0 = scmp.ne.s32.totalorder %s2545_s16, %s2541_s15  ;;  %p2986_p1 = scmp.eq.s32.totalorder %s2615_s19, 0 }
   0x9   : > { %p135_p3 = scmp.eq.s32.totalorder %s1593_s20, 1  ;;  %p1594_p5 = scmp.ge.s32.totalorder %s2553_s18, 1 }
   0xa   : > { %p2624_p4 = por %p2986_p1, %p42_p0  ;;  %p142_p7 = scmp.lt.s32.totalorder %s2553_s18, 3 }
   0xb   : > { %p2629_p6 = por %p135_p3, %p42_p0  ;;  %s2555_s24 = smov [#allocation5]  }
   0xc   : > { %s2989_s21 = scalar_select %p2624_p4, 1, 0 }
   0xd   : > { %s2990_s22 = scalar_select %p2629_p6, 1, 0 }
   0xe   : > { %p2634_p8 = pnand %p1594_p5, %p142_p7  ;;  %s154_s25 = sshll.u32 %s2555_s24, 4  ;;  %s2638_s25 = int_to_ptr.vmem [resolvable:$true] %s154_s25 }
   0xf   : > { %s2556_s27 = smov [#allocation7]   ;;  %s2365_s5 = scalar_lea.hbm %s2982_s1, 8704 }
  0x10   : > { %s2991_s23 = scalar_select %p2634_p8, 1, 0 }
  0x11   : > { %p2275_p9 = pneg %p2634_p8  ;;  %s167_s28 = sshll.u32 %s2556_s27, 4  ;;  %s2649_s28 = int_to_ptr.vmem [resolvable:$true] %s167_s28 }
  0x12   : > { %p2366_p12 = scmp.ne.s32.totalorder %s2982_s1, %s2365_s5  ;;  %p2372_p5 = scmp.lt.u32.totalorder %s2365_s5, %s2982_s1 }
  0x13   : > { %p2645_p11 = pnand %p2275_p9, %p2986_p1 }
  0x15   : > { %p2659_p13 = pneg %p2645_p11 }
  0x17   : > { %p2368_p0 = pnand %p2659_p13, %p2366_p12 }
  0x19   : > { %p2369_p3 = pneg %p2368_p0 }
  0x1b   : > { %p2374_p7 = pnand %p2372_p5, %p2369_p3 }
  0x1d   : > { %2377 = shalt.err (!%p2374_p7)
}
  0x1e   : > { %s2378_s11 = scalar_lea.vmem %s2638_s25, 8704  ;;  %p2386_p2 = scmp.lt.s32.totalorder %s2638_s25, %s2638_s25 }
  0x1f   : > { %p2379_p9 = scmp.ne.s32.totalorder %s2638_s25, %s2378_s11  ;;  %p2387_p6 = scmp.lt.s32.totalorder %s2378_s11, %s2378_s11 }
  0x21   : > { %p2381_p10 = pnand %p2379_p9, %p2659_p13  ;;  %p2388_p12 = por %p2387_p6, %p2386_p2 }
  0x23   : > { %p2382_p1 = pneg %p2381_p10 }
  0x25   : > { %p2389_p0 = pnand %p2388_p12, %p2382_p1 }
  0x27   : > { %2392 = shalt.err (!%p2389_p0)
}
  0x28   : > { %s2557_s12 = smov 512   ;;  %s2558_s13 = smov 32  }
  0x29   : > { %2278 = dma.hbm_to_vmem [thread:$0]  (!%p2645_p11), %s2982_s1, 8704, %s2638_s25, [#allocation6], %s2557_s12, %s2557_s12, %s2558_s13  }
  0x2a   : > { %s2393_s29 = scalar_lea.hbm %s2983_s2, 37248 }
  0x2b   : > { %p2394_p2 = scmp.ne.s32.totalorder %s2983_s2, %s2393_s29  ;;  %p2400_p10 = scmp.lt.u32.totalorder %s2393_s29, %s2983_s2 }
  0x2d   : > { %p2396_p1 = pnand %p2394_p2, %p2659_p13 }
  0x2f   : > { %p2397_p6 = pneg %p2396_p1 }
  0x31   : > { %p2402_p3 = pnand %p2400_p10, %p2397_p6 }
  0x33   : > { %2405 = shalt.err (!%p2402_p3)
}
  0x34   : > { %s2406_s25 = scalar_lea.vmem %s2649_s28, 37248  ;;  %p2414_p12 = scmp.lt.s32.totalorder %s2649_s28, %s2649_s28 }
  0x35   : > { %p2407_p5 = scmp.ne.s32.totalorder %s2649_s28, %s2406_s25  ;;  %p2415_p0 = scmp.lt.s32.totalorder %s2406_s25, %s2406_s25 }
  0x37   : > { %p2409_p7 = pnand %p2407_p5, %p2659_p13  ;;  %p2416_p2 = por %p2415_p0, %p2414_p12 }
  0x39   : > { %p2410_p9 = pneg %p2409_p7 }
  0x3b   : > { %p2417_p1 = pnand %p2416_p2, %p2410_p9 }
  0x3d   : > { %2420 = shalt.err (!%p2417_p1)
}
  0x3e   : > { %s2559_s9 = smov 384   ;;  %s2560_s10 = smov 24  }
  0x3f   : > { %2281 = dma.hbm_to_vmem [thread:$0]  (!%p2645_p11), %s2983_s2, 37248, %s2649_s28, [#allocation6], %s2559_s9, %s2559_s9, %s2560_s10  }
  0x40   : > { %s2561_s13 = smov [#allocation8]   ;;  %s2421_s27 = scalar_lea.hbm %s2984_s3, 2048 }
  0x41   : > { %s180_s14 = sshll.u32 %s2561_s13, 4  ;;  %p2422_p6 = scmp.ne.s32.totalorder %s2984_s3, %s2421_s27  ;;  %s181_s14 = int_to_ptr.vmem [resolvable:$true] %s180_s14 }
  0x42   : > { %p2428_p5 = scmp.lt.u32.totalorder %s2421_s27, %s2984_s3 }
  0x43   : > { %p2424_p10 = pnand %p2422_p6, %p2659_p13 }
  0x45   : > { %p2425_p3 = pneg %p2424_p10 }
  0x47   : > { %p2430_p7 = pnand %p2428_p5, %p2425_p3 }
  0x49   : > { %2433 = shalt.err (!%p2430_p7)
}
  0x4a   : > { %s2434_s28 = scalar_lea.vmem %s181_s14, 2048  ;;  %p2442_p2 = scmp.lt.s32.totalorder %s181_s14, %s181_s14 }
  0x4b   : > { %p2435_p9 = scmp.ne.s32.totalorder %s181_s14, %s2434_s28  ;;  %p2443_p1 = scmp.lt.s32.totalorder %s2434_s28, %s2434_s28 }
  0x4d   : > { %p2437_p12 = pnand %p2435_p9, %p2659_p13  ;;  %p2444_p4 = por %p2443_p1, %p2442_p2 }
  0x4f   : > { %p2438_p0 = pneg %p2437_p12 }
  0x51   : > { %p2445_p8 = pnand %p2444_p4, %p2438_p0 }
  0x53   : > { %2448 = shalt.err (!%p2445_p8)
}
  0x54   : > { %s2562_s7 = smov 128   ;;  %s2563_s8 = smov 8  }
  0x55   : > { %2284 = dma.hbm_to_vmem [thread:$0]  (!%p2645_p11), %s2984_s3, 2048, %s181_s14, [#allocation9], %s2562_s7, %s2562_s7, %s2563_s8  }
  0x56   : > { %s2725_s10 = sadd.s32 1, %s2553_s18   ;;  %s29_s12 = sadd.s32 1, %s2549_s17 }
  0x57   : > { %s26_s11 = ssub.s32 %s2553_s18, %s2725_s10  ;;  %p36_p8 = scmp.ne.s32.totalorder %s2549_s17, %s2545_s16 }
  0x58   : > { %p27_p4 = scmp.eq.s32.totalorder %s26_s11, 0  ;;  %p37_p13 = scmp.eq.s32.totalorder %s2553_s18, 0 }
  0x59   : > { %p2296_p6 = scmp.lt.s32.totalorder %s2553_s18, 2  ;;  %p2994_p3 = scmp.eq.s32.totalorder %s2615_s19, 1 }
  0x5a   : > { %s2735_s13 = scalar_select %p27_p4, %s2549_s17, %s29_s12  }
  0x5b   : > { %p38_p10 = por %p37_p13, %p36_p8  ;;  %p2739_p5 = por %p2994_p3, %p36_p8 }
  0x5c   : > { %s194_s20 = sand.u32 1, %s2549_s17   ;;  %s1613_s24 = sshll.u32 %s2553_s18, 8 }
  0x5d   : > { %s1599_s14 = sshll.u32 %s194_s20, 4  ;;  %s2748_s30 = scalar_lea.hbm %s2981_s0, %s1613_s24 }
  0x5e   : > { %s198_s5 = scalar_lea.vmem [#allocation2], %s1599_s14  ;;  %p2750_p11 = pnand %p2296_p6, %p38_p10 }
  0x5f   : > { %s205_s6 = sshll.u32 %s198_s5, 4  ;;  %s2756_s25 = scalar_lea.sflag [#allocation3], %s194_s20  ;;  %s2754_s6 = int_to_ptr.vmem [resolvable:$true] %s205_s6 }
  0x60   : > { %s2449_s9 = scalar_lea.hbm %s2748_s30, 256  ;;  %p2451_p9 = pneg %p2750_p11 }
  0x61   : > { %p2450_p7 = scmp.ne.s32.totalorder %s2748_s30, %s2449_s9  ;;  %s2454_s24 = scalar_lea.hbm %s2981_s0, 512 }
  0x62   : > { %p2455_p2 = scmp.lt.u32.totalorder %s2748_s30, %s2981_s0  ;;  %p2456_p1 = scmp.lt.u32.totalorder %s2454_s24, %s2449_s9 }
  0x63   : > { %p2452_p12 = pnand %p2451_p9, %p2450_p7  ;;  %p2458_p8 = scmp.lt.u32.totalorder %s2449_s9, %s2748_s30 }
  0x64   : > { %p2457_p4 = por %p2456_p1, %p2455_p2 }
  0x65   : > { %p2453_p0 = pneg %p2452_p12 }
  0x66   : > { %p2459_p13 = por %p2458_p8, %p2457_p4 }
  0x68   : > { %p2460_p6 = pnand %p2459_p13, %p2453_p0 }
  0x6a   : > { %2463 = shalt.err (!%p2460_p6)
}
  0x6b   : > { %s2464_s20 = scalar_lea.vmem %s2754_s6, 256  ;;  %s2564_s29 = smov [#allocation2]  }
  0x6c   : > { %p2465_p10 = scmp.ne.s32.totalorder %s2754_s6, %s2464_s20  ;;  %s2469_s5 = sshll.u32 %s2564_s29, 4  ;;  %s2470_s5 = int_to_ptr.vmem [resolvable:$false] %s2469_s5 }
  0x6d   : > { %s2471_s11 = scalar_lea.vmem %s2470_s5, 512  ;;  %p2472_p12 = scmp.lt.s32.totalorder %s2754_s6, %s2470_s5 }
  0x6e   : > { %p2467_p3 = pnand %p2465_p10, %p2451_p9  ;;  %p2473_p2 = scmp.lt.s32.totalorder %s2471_s11, %s2464_s20 }
  0x70   : > { %p2468_p7 = pneg %p2467_p3  ;;  %p2474_p1 = por %p2473_p2, %p2472_p12 }
  0x72   : > { %p2475_p4 = pnand %p2474_p1, %p2468_p7 }
  0x74   : > { %2478 = shalt.err (!%p2475_p4)
}
  0x75   : > { %2288 = dma.hbm_to_vmem [thread:$0]  (!%p2750_p11), %s2748_s30, 256, %s2754_s6, %s2756_s25, %s2562_s7, %s2562_s7, %s2563_s8  }
  0x76   : > { %p2997_p9 = scmp.ne.s32.totalorder %s2991_s23, 0 }
  0x77   : > { %s2790_s9 = sand.u32 (!%p2997_p9), 1, %s2545_s16   ;;  %p2998_p0 = scmp.ne.s32.totalorder (!%p2997_p9), %s2989_s21, 0 }
  0x78   : > { %217 = sbr.rel (%p2997_p9) target bundleno = 1064 (0x428), region = 36  ;;  %s1603_s12 = sshll.u32 (!%p2997_p9), %s2790_s9, 4 }
  0x79   : > { %s220_s24 = scalar_lea.sflag (!%p2997_p9), [#allocation3], %s2790_s9  ;;  %s2796_s28 = scalar_lea.vmem (!%p2997_p9), [#allocation2], %s1603_s12 }
  0x7f   : > { %2524 = dma.done.wait (%p2998_p0), %s220_s24, 256  }
  0x80   : > { %2526 = vsyncadd (%p2998_p0), %s220_s24, 4294967040  ;;  %p2999_p11 = scmp.eq.s32.totalorder %s2615_s19, 0 }
  0x82   : > { %2528 = dma.done.wait (%p2999_p11), [#allocation6], 45952   ;;  %p3000_p8 = pmov %p2999_p11 }
  0x84   : > { %2530 = vsyncadd (%p3000_p8), [#allocation6], 4294921344  ;;  %p3001_p13 = pmov %p3000_p8 }
  0x85   : > { %p3002_p6 = pmov %p3000_p8 }
  0x86   : > { %2532 = dma.done.wait (%p3001_p13), [#allocation9], 2048  }
  0x87   : > { %2534 = vsyncadd (%p3002_p6), [#allocation9], 4294965248  ;;  %v2565_v0 = vmov 0.0   ;;  %v265_v1 = vld [vmem:[#allocation5 + $0x8] sm:$0xff]  ;;  %v264_v3 = vld [vmem:[#allocation5] sm:$0xff]  ;;  %s1614_s21 = sshll.u32 %s2615_s19, 8 }
  0x88   : > { %721 = vmatprep.mubr.f32.mxu1 %v2565_v0  ;;  %v269_v2 = vld [vmem:[#allocation5 + $0x28] sm:$0xff]  ;;  %v268_v5 = vld [vmem:[#allocation5 + $0x20] sm:$0xff]  ;;  %v525_v48 = vld [vmem:[#allocation7 + $0x618] sm:$0xff]  ;;  %s259_s23 = scalar_lea.vmem [#allocation10], %s1603_s12  ;;  %s2935_s6 = scalar_lea.hbm %s2985_s4, %s1614_s21 }
  0x89   : > { %v1835_v4 = vpack.c.bf16 %v269_v2, %v265_v1  ;;  %v273_v6 = vld [vmem:[#allocation5 + $0x48] sm:$0xff]  ;;  %v1837_v8 = vpack.c.bf16 %v268_v5, %v264_v3  ;;  %v272_v10 = vld [vmem:[#allocation5 + $0x40] sm:$0xff]  ;;  %v529_v49 = vld [vmem:[#allocation7 + $0x638] sm:$0xff]  ;;  %s1491_s7 = sshll.u32 %s259_s23, 4  ;;  %s1478_s19 = scalar_lea.sflag [#allocation4], %s2790_s9  ;;  %s2937_s7 = int_to_ptr.vmem [resolvable:$true] %s1491_s7 }
  0x8a   : > { %v277_v7 = vld [vmem:[#allocation5 + $0x68] sm:$0xff]  ;;  %v276_v11 = vld [vmem:[#allocation5 + $0x60] sm:$0xff]  ;;  %v532_v50 = vld [vmem:[#allocation7 + $0x650] sm:$0xff]  ;;  %s2479_s25 = scalar_lea.vmem %s2937_s7, 256  ;;  %s2566_s14 = smov [#allocation10]  }
  0x8b   : > { %v1839_v9 = vpack.c.bf16 %v277_v7, %v273_v6  ;;  %v281_v12 = vld [vmem:[#allocation5 + $0x88] sm:$0xff]  ;;  %1836 = vmatprep.subr.bf16.mxu1 %v1835_v4  ;;  %v1841_v14 = vpack.c.bf16 %v276_v11, %v272_v10  ;;  %v280_v16 = vld [vmem:[#allocation5 + $0x80] sm:$0xff]  ;;  %v1903_v53 = vpack.c.bf16 %v532_v50, %v529_v49  ;;  %v528_v54 = vld [vmem:[#allocation7 + $0x630] sm:$0xff]  ;;  %p2480_p10 = scmp.ne.s32.totalorder %s2937_s7, %s2479_s25  ;;  %s2483_s27 = sshll.u32 %s2566_s14, 4  ;;  %s2484_s27 = int_to_ptr.vmem [resolvable:$false] %s2483_s27 }
  0x8c   : > { %v285_v13 = vld [vmem:[#allocation5 + $0xa8] sm:$0xff]  ;;  %1838 = vmatpush1.bf16.msra.mxu1 %v1837_v8  ;;  %v284_v17 = vld [vmem:[#allocation5 + $0xa0] sm:$0xff]  ;;  %v267_v61 = vld [vmem:[#allocation5 + $0x18] sm:$0xff]  ;;  %s2485_s20 = scalar_lea.vmem %s2484_s27, 512  ;;  %p2486_p12 = scmp.lt.s32.totalorder %s2937_s7, %s2484_s27 }
  0x8d   : > { %1840 = vmatprep.subr.bf16.mxu1 %v1839_v9  ;;  %v1843_v15 = vpack.c.bf16 %v285_v13, %v281_v12  ;;  %v289_v18 = vld [vmem:[#allocation5 + $0xc8] sm:$0xff]  ;;  %v1845_v20 = vpack.c.bf16 %v284_v17, %v280_v16  ;;  %v288_v22 = vld [vmem:[#allocation5 + $0xc0] sm:$0xff]  ;;  %v271_v62 = vld [vmem:[#allocation5 + $0x38] sm:$0xff]  ;;  %p2481_p3 = pnand %p2480_p10, %p2739_p5  ;;  %p2487_p2 = scmp.lt.s32.totalorder %s2485_s20, %s2479_s25 }
  0x8e   : > { %v293_v19 = vld [vmem:[#allocation5 + $0xe8] sm:$0xff]  ;;  %v292_v23 = vld [vmem:[#allocation5 + $0xe0] sm:$0xff]  ;;  %v537_v3 = vld [vmem:[#allocation7 + $0x678] sm:$0xff]  ;;  %v1867_v7 = vpack.c.bf16 %v271_v62, %v267_v61 }
  0x8f   : > { %v1847_v21 = vpack.c.bf16 %v293_v19, %v289_v18  ;;  %v297_v24 = vld [vmem:[#allocation5 + $0x108] sm:$0xff]  ;;  %v1849_v26 = vpack.c.bf16 %v292_v23, %v288_v22  ;;  %v296_v28 = vld [vmem:[#allocation5 + $0x100] sm:$0xff]  ;;  %v541_v5 = vld [vmem:[#allocation7 + $0x698] sm:$0xff]  ;;  %p2482_p7 = pneg %p2481_p3  ;;  %p2488_p1 = por %p2487_p2, %p2486_p12 }
  0x90   : > { %1842 = vmatpush1.bf16.msra.mxu1 %v1841_v14  ;;  %v301_v25 = vld [vmem:[#allocation5 + $0x128] sm:$0xff]  ;;  %v300_v29 = vld [vmem:[#allocation5 + $0x120] sm:$0xff]  ;;  %v544_v6 = vld [vmem:[#allocation7 + $0x6b0] sm:$0xff] }
  0x91   : > { %1844 = vmatprep.subr.bf16.mxu1 %v1843_v15  ;;  %v1851_v27 = vpack.c.bf16 %v301_v25, %v297_v24  ;;  %v305_v30 = vld [vmem:[#allocation5 + $0x148] sm:$0xff]  ;;  %v1853_v32 = vpack.c.bf16 %v300_v29, %v296_v28  ;;  %v304_v34 = vld [vmem:[#allocation5 + $0x140] sm:$0xff]  ;;  %v266_v8 = vld [vmem:[#allocation5 + $0x10] sm:$0xff]  ;;  %v1911_v13 = vpack.c.bf16 %v544_v6, %v541_v5  ;;  %p2489_p4 = pnand %p2488_p1, %p2482_p7 }
  0x92   : > { %v309_v31 = vld [vmem:[#allocation5 + $0x168] sm:$0xff]  ;;  %v308_v35 = vld [vmem:[#allocation5 + $0x160] sm:$0xff]  ;;  %v270_v9 = vld [vmem:[#allocation5 + $0x30] sm:$0xff] }
  0x93   : > { %v1855_v33 = vpack.c.bf16 %v309_v31, %v305_v30  ;;  %v313_v36 = vld [vmem:[#allocation5 + $0x188] sm:$0xff]  ;;  %v1857_v38 = vpack.c.bf16 %v308_v35, %v304_v34  ;;  %v312_v39 = vld [vmem:[#allocation5 + $0x180] sm:$0xff]  ;;  %v275_v10 = vld [vmem:[#allocation5 + $0x58] sm:$0xff]  ;;  %v1869_v15 = vpack.c.bf16 %v270_v9, %v266_v8 }
  0x94   : > { %1846 = vmatpush1.bf16.msra.mxu1 %v1845_v20  ;;  %v317_v37 = vld [vmem:[#allocation5 + $0x1a8] sm:$0xff]  ;;  %v316_v41 = vld [vmem:[#allocation5 + $0x1a0] sm:$0xff]  ;;  %v279_v11 = vld [vmem:[#allocation5 + $0x78] sm:$0xff] }
  0x95   : > { %1848 = vmatprep.subr.bf16.mxu1 %v1847_v21  ;;  %v1859_v40 = vpack.c.bf16 %v317_v37, %v313_v36  ;;  %v321_v42 = vld [vmem:[#allocation5 + $0x1c8] sm:$0xff]  ;;  %v526_v45 = vld [vmem:[#allocation7 + $0x620] sm:$0xff]  ;;  %v1861_v51 = vpack.c.bf16 %v316_v41, %v312_v39  ;;  %v1871_v16 = vpack.c.bf16 %v279_v11, %v275_v10  ;;  %v274_v17 = vld [vmem:[#allocation5 + $0x50] sm:$0xff] }
  0x96   : > { %v325_v43 = vld [vmem:[#allocation5 + $0x1e8] sm:$0xff]  ;;  %v522_v46 = vld [vmem:[#allocation7 + $0x600] sm:$0xff]  ;;  %v278_v18 = vld [vmem:[#allocation5 + $0x70] sm:$0xff] }
  0x97   : > { %v523_v44 = vld [vmem:[#allocation7 + $0x608] sm:$0xff]  ;;  %v1901_v52 = vpack.c.bf16 %v525_v48, %v522_v46  ;;  %v1863_v57 = vpack.c.bf16 %v325_v43, %v321_v42  ;;  %v320_v58 = vld [vmem:[#allocation5 + $0x1c0] sm:$0xff]  ;;  %v283_v19 = vld [vmem:[#allocation5 + $0x98] sm:$0xff]  ;;  %v1873_v21 = vpack.c.bf16 %v278_v18, %v274_v17 }
  0x98   : > { %1850 = vmatpush1.bf16.msra.mxu1 %v1849_v26  ;;  %v1899_v47 = vpack.c.bf16 %v526_v45, %v523_v44  ;;  %v531_v55 = vld [vmem:[#allocation7 + $0x648] sm:$0xff]  ;;  %v324_v59 = vld [vmem:[#allocation5 + $0x1e0] sm:$0xff]  ;;  %v287_v20 = vld [vmem:[#allocation5 + $0xb8] sm:$0xff] }
  0x99   : > { %1852 = vmatprep.subr.bf16.mxu1 %v1851_v27  ;;  %v535_v56 = vld [vmem:[#allocation7 + $0x668] sm:$0xff]  ;;  %v538_v60 = vld [vmem:[#allocation7 + $0x680] sm:$0xff]  ;;  %v1905_v63 = vpack.c.bf16 %v531_v55, %v528_v54  ;;  %v1865_v4 = vpack.c.bf16 %v324_v59, %v320_v58  ;;  %v1875_v23 = vpack.c.bf16 %v287_v20, %v283_v19  ;;  %v282_v24 = vld [vmem:[#allocation5 + $0x90] sm:$0xff] }
  0x9a   : > { %1900 = vmatprep.subr.bf16.mxu0 %v1899_v47  ;;  %v1907_v1 = vpack.c.bf16 %v538_v60, %v535_v56  ;;  %v534_v2 = vld [vmem:[#allocation7 + $0x660] sm:$0xff]  ;;  %v263_v22 = vld [vmem:[%s2796_s28 + $0x8] sm:$0xff]  ;;  %v286_v25 = vld [vmem:[#allocation5 + $0xb0] sm:$0xff] }
  0x9b   : > { %1902 = vmatpush1.bf16.msra.mxu0 %v1901_v52  ;;  %v1909_v12 = vpack.c.bf16 %v537_v3, %v534_v2  ;;  %v2812_v14 = vld [vmem:[%s2796_s28] sm:$0xff]  ;;  %v291_v26 = vld [vmem:[#allocation5 + $0xd8] sm:$0xff]  ;;  %v1877_v28 = vpack.c.bf16 %v286_v25, %v282_v24  ;;  %v543_v58 = vld [vmem:[#allocation7 + $0x6a8] sm:$0xff] }
  0x9c   : > { %1854 = vmatpush1.bf16.msra.mxu1 %v1853_v32  ;;  %1904 = vmatprep.subr.bf16.mxu0 %v1903_v53  ;;  %v295_v27 = vld [vmem:[#allocation5 + $0xf8] sm:$0xff]  ;;  %v290_v30 = vld [vmem:[#allocation5 + $0xd0] sm:$0xff]  ;;  %v547_v60 = vld [vmem:[#allocation7 + $0x6c8] sm:$0xff] }
  0x9d   : > { %1856 = vmatprep.subr.bf16.mxu1 %v1855_v33  ;;  %v1879_v29 = vpack.c.bf16 %v295_v27, %v291_v26  ;;  %v294_v31 = vld [vmem:[#allocation5 + $0xf0] sm:$0xff]  ;;  %v299_v32 = vld [vmem:[#allocation5 + $0x118] sm:$0xff]  ;;  %v550_v61 = vld [vmem:[#allocation7 + $0x6e0] sm:$0xff] }
  0x9e   : > { %v303_v33 = vld [vmem:[#allocation5 + $0x138] sm:$0xff]  ;;  %v1881_v34 = vpack.c.bf16 %v294_v31, %v290_v30  ;;  %v298_v36 = vld [vmem:[#allocation5 + $0x110] sm:$0xff]  ;;  %v1915_v62 = vpack.c.bf16 %v550_v61, %v547_v60  ;;  %v559_v8 = vld [vmem:[#allocation7 + $0x728] sm:$0xff] }
  0x9f   : > { %1906 = vmatpush1.bf16.msra.mxu0 %v1905_v63  ;;  %v1883_v35 = vpack.c.bf16 %v303_v33, %v299_v32  ;;  %v302_v37 = vld [vmem:[#allocation5 + $0x130] sm:$0xff]  ;;  %v311_v39 = vld [vmem:[#allocation5 + $0x178] sm:$0xff]  ;;  %v546_v63 = vld [vmem:[#allocation7 + $0x6c0] sm:$0xff] }
  0xa0   : > { %1858 = vmatpush1.bf16.msra.mxu1 %v1857_v38  ;;  %1908 = vmatprep.subr.bf16.mxu0 %v1907_v1  ;;  %v307_v38 = vld [vmem:[#allocation5 + $0x158] sm:$0xff]  ;;  %v306_v42 = vld [vmem:[#allocation5 + $0x150] sm:$0xff]  ;;  %v558_v11 = vld [vmem:[#allocation7 + $0x720] sm:$0xff] }
  0xa1   : > { %1860 = vmatprep.subr.bf16.mxu1 %v1859_v40  ;;  %v1885_v40 = vpack.c.bf16 %v302_v37, %v298_v36  ;;  %v1887_v41 = vpack.c.bf16 %v311_v39, %v307_v38  ;;  %v310_v43 = vld [vmem:[#allocation5 + $0x170] sm:$0xff]  ;;  %v315_v44 = vld [vmem:[#allocation5 + $0x198] sm:$0xff]  ;;  %v567_v19 = vld [vmem:[#allocation7 + $0x768] sm:$0xff] }
  0xa2   : > { %v319_v45 = vld [vmem:[#allocation5 + $0x1b8] sm:$0xff]  ;;  %v1889_v46 = vpack.c.bf16 %v310_v43, %v306_v42  ;;  %v314_v48 = vld [vmem:[#allocation5 + $0x190] sm:$0xff]  ;;  %v571_v20 = vld [vmem:[#allocation7 + $0x788] sm:$0xff] }
  0xa3   : > { %1910 = vmatpush1.bf16.msra.mxu0 %v1909_v12  ;;  %v1891_v47 = vpack.c.bf16 %v319_v45, %v315_v44  ;;  %v318_v49 = vld [vmem:[#allocation5 + $0x1b0] sm:$0xff]  ;;  %v323_v50 = vld [vmem:[#allocation5 + $0x1d8] sm:$0xff]  ;;  %v527_v25 = vld [vmem:[#allocation7 + $0x628] sm:$0xff] }
  0xa4   : > { %1862 = vmatpush1.bf16.msra.mxu1 %v1861_v51  ;;  %1912 = vmatprep.subr.bf16.mxu0 %v1911_v13  ;;  %v327_v51 = vld [vmem:[#allocation5 + $0x1f8] sm:$0xff]  ;;  %v1893_v52 = vpack.c.bf16 %v318_v49, %v314_v48  ;;  %v322_v54 = vld [vmem:[#allocation5 + $0x1d0] sm:$0xff]  ;;  %v578_v27 = vld [vmem:[#allocation7 + $0x7c0] sm:$0xff] }
  0xa5   : > { %1864 = vmatprep.subr.bf16.mxu1 %v1863_v57  ;;  %v1895_v53 = vpack.c.bf16 %v327_v51, %v323_v50  ;;  %v326_v55 = vld [vmem:[#allocation5 + $0x1f0] sm:$0xff]  ;;  %v549_v1 = vld [vmem:[#allocation7 + $0x6d8] sm:$0xff]  ;;  %v570_v30 = vld [vmem:[#allocation7 + $0x780] sm:$0xff] }
  0xa6   : > { %v1897_v56 = vpack.c.bf16 %v326_v55, %v322_v54  ;;  %v540_v57 = vld [vmem:[#allocation7 + $0x690] sm:$0xff]  ;;  %v1917_v2 = vpack.c.bf16 %v549_v1, %v546_v63  ;;  %v553_v3 = vld [vmem:[#allocation7 + $0x6f8] sm:$0xff]  ;;  %v530_v32 = vld [vmem:[#allocation7 + $0x640] sm:$0xff] }
  0xa7   : > { %v1913_v59 = vpack.c.bf16 %v543_v58, %v540_v57  ;;  %v552_v5 = vld [vmem:[#allocation7 + $0x6f0] sm:$0xff]  ;;  %v561_v12 = vld [vmem:[#allocation7 + $0x738] sm:$0xff]  ;;  %v539_v43 = vld [vmem:[#allocation7 + $0x688] sm:$0xff] }
  0xa8   : > { %1866 = vmatpush1.bf16.msra.mxu1 %v1865_v4  ;;  %v556_v4 = vld [vmem:[#allocation7 + $0x710] sm:$0xff]  ;;  %v565_v13 = vld [vmem:[#allocation7 + $0x758] sm:$0xff]  ;;  %v590_v45 = vld [vmem:[#allocation7 + $0x820] sm:$0xff] }
  0xa9   : > { %1868 = vmatprep.subr.bf16.mxu1 %v1867_v7  ;;  %1914 = vmatpush1.bf16.msra.mxu0 %v1913_v59  ;;  %v1919_v6 = vpack.c.bf16 %v556_v4, %v553_v3  ;;  %v555_v7 = vld [vmem:[#allocation7 + $0x708] sm:$0xff]  ;;  %v572_v17 = vld [vmem:[#allocation7 + $0x790] sm:$0xff]  ;;  %v533_v36 = vld [vmem:[#allocation7 + $0x658] sm:$0xff] }
  0xaa   : > { %1916 = vmatprep.subr.bf16.mxu0 %v1915_v62  ;;  %v1921_v9 = vpack.c.bf16 %v555_v7, %v552_v5  ;;  %v524_v24 = vld [vmem:[#allocation7 + $0x610] sm:$0xff]  ;;  %v1969_v38 = vpack.c.bf16 %v533_v36, %v530_v32  ;;  %v579_v48 = vld [vmem:[#allocation7 + $0x7c8] sm:$0xff]  ;;  %v593_v50 = vld [vmem:[#allocation7 + $0x838] sm:$0xff] }
  0xab   : > { %722 = vmatmul.mubr.f32.vlgmr.msra.gmra.mrb[0].mxu1 %v2812_v14  ;;  %v1965_v26 = vpack.c.bf16 %v527_v25, %v524_v24  ;;  %v580_v37 = vld [vmem:[#allocation7 + $0x7d0] sm:$0xff]  ;;  %v583_v51 = vld [vmem:[#allocation7 + $0x7e8] sm:$0xff]  ;;  %v585_v57 = vld [vmem:[#allocation7 + $0x7f8] sm:$0xff] }
  0xac   : > { %1870 = vmatpush1.bf16.msra.mxu1 %v1869_v15  ;;  %727 = vmatprep.mubr.f32.mxu1 %v2565_v0  ;;  %v1925_v15 = vpack.c.bf16 %v561_v12, %v558_v11  ;;  %v584_v39 = vld [vmem:[#allocation7 + $0x7f0] sm:$0xff]  ;;  %v589_v58 = vld [vmem:[#allocation7 + $0x818] sm:$0xff]  ;;  %v591_v63 = vld [vmem:[#allocation7 + $0x828] sm:$0xff] }
  0xad   : > { %1872 = vmatprep.subr.bf16.mxu1 %v1871_v16  ;;  %1918 = vmatpush1.bf16.msra.mxu0 %v1917_v2  ;;  %v564_v16 = vld [vmem:[#allocation7 + $0x750] sm:$0xff]  ;;  %v542_v1 = vld [vmem:[#allocation7 + $0x6a0] sm:$0xff]  ;;  %v545_v3 = vld [vmem:[#allocation7 + $0x6b8] sm:$0xff] }
  0xae   : > { %1920 = vmatprep.subr.bf16.mxu0 %v1919_v6  ;;  %v536_v42 = vld [vmem:[#allocation7 + $0x670] sm:$0xff]  ;;  %v1977_v4 = vpack.c.bf16 %v545_v3, %v542_v1  ;;  %v595_v5 = vld [vmem:[#allocation7 + $0x848] sm:$0xff]  ;;  %v598_v6 = vld [vmem:[#allocation7 + $0x860] sm:$0xff] }
  0xaf   : > { %728 = vmatmul.mubr.f32.gmra.mrb[2].mxu1 %v263_v22  ;;  %v1973_v49 = vpack.c.bf16 %v539_v43, %v536_v42  ;;  %v592_v59 = vld [vmem:[#allocation7 + $0x830] sm:$0xff]  ;;  %v554_v25 = vld [vmem:[#allocation7 + $0x700] sm:$0xff]  ;;  %v611_v32 = vld [vmem:[#allocation7 + $0x8c8] sm:$0xff] }
  0xb0   : > { %1874 = vmatpush1.bf16.msra.mxu1 %v1873_v21  ;;  %798 = vmatprep.mubr.f32.mxu1 %v2565_v0  ;;  %v575_v21 = vld [vmem:[#allocation7 + $0x7a8] sm:$0xff]  ;;  %v1943_v61 = vpack.c.bf16 %v592_v59, %v589_v58  ;;  %v588_v62 = vld [vmem:[#allocation7 + $0x810] sm:$0xff]  ;;  %v614_v42 = vld [vmem:[#allocation7 + $0x8e0] sm:$0xff] }
  0xb1   : > { %1876 = vmatprep.subr.bf16.mxu1 %v1875_v23  ;;  %1922 = vmatpush1.bf16.msra.mxu0 %v1921_v9  ;;  %v1963_v23 = vpack.c.bf16 %v575_v21, %v572_v17  ;;  %v1945_v2 = vpack.c.bf16 %v591_v63, %v588_v62  ;;  %v596_v7 = vld [vmem:[#allocation7 + $0x850] sm:$0xff]  ;;  %v594_v9 = vld [vmem:[#allocation7 + $0x840] sm:$0xff]  ;;  %v617_v43 = vld [vmem:[#allocation7 + $0x8f8] sm:$0xff]  ;;  %v637_v62 = vlaneseq }
  0xb2   : > { %v604_v17 = vld [vmem:[#allocation7 + $0x890] sm:$0xff] }
  0xb3   : > { %v600_v21 = vld [vmem:[#allocation7 + $0x870] sm:$0xff]  ;;  %v2826_v63 = vshrl.u32 %v637_v62, 7  ;;  %v401_v62 = vld [vmem:[#allocation7 + $0x238] sm:$0xff] }
  0xb4   : > { %1878 = vmatpush1.bf16.msra.mxu1 %v1877_v28  ;;  %v581_v28 = vld [vmem:[#allocation7 + $0x7d8] sm:$0xff] }
  0xb5   : > { %1880 = vmatprep.subr.bf16.mxu1 %v1879_v29  ;;  %v1929_v29 = vpack.c.bf16 %v567_v19, %v564_v16  ;;  %v1967_v31 = vpack.c.bf16 %v581_v28, %v578_v27  ;;  %v601_v16 = vld [vmem:[#allocation7 + $0x878] sm:$0xff]  ;;  %v607_v28 = vld [vmem:[#allocation7 + $0x8a8] sm:$0xff]  ;;  %v647_v1 = vsub.s32 2, %v2826_v63 }
  0xb6   : > { %v1951_v19 = vpack.c.bf16 %v604_v17, %v601_v16  ;;  %v2830_v3 = vld [vmem:[#allocation5 + $0x200] ss:$8 sm:$0xf] }
  0xb7   : > { %v330_v17 = vld [vmem:[#allocation7] sm:$0xff] }
  0xb8   : > { %1882 = vmatpush1.bf16.msra.mxu1 %v1881_v34  ;;  %v573_v34 = vld [vmem:[#allocation7 + $0x798] sm:$0xff] }
  0xb9   : > { %1884 = vmatprep.subr.bf16.mxu1 %v1883_v35  ;;  %v577_v35 = vld [vmem:[#allocation7 + $0x7b8] sm:$0xff]  ;;  %v1933_v44 = vpack.c.bf16 %v573_v34, %v570_v30  ;;  %v608_v30 = vld [vmem:[#allocation7 + $0x8b0] sm:$0xff] }
  0xba   : > { %v609_v34 = vld [vmem:[#allocation7 + $0x8b8] sm:$0xff] }
  0xbc   : > { %1886 = vmatpush1.bf16.msra.mxu1 %v1885_v40  ;;  %v587_v40 = vld [vmem:[#allocation7 + $0x808] sm:$0xff] }
  0xbd   : > { %1888 = vmatprep.subr.bf16.mxu1 %v1887_v41  ;;  %v1971_v41 = vpack.c.bf16 %v587_v40, %v584_v39  ;;  %v613_v39 = vld [vmem:[#allocation7 + $0x8d8] sm:$0xff] }
  0xc0   : > { %1890 = vmatpush1.bf16.msra.mxu1 %v1889_v46  ;;  %v1935_v46 = vpack.c.bf16 %v580_v37, %v577_v35  ;;  %v1987_v35 = vpack.c.bf16 %v611_v32, %v608_v30  ;;  %v560_v37 = vld [vmem:[#allocation7 + $0x730] sm:$0xff] }
  0xc1   : > { %1892 = vmatprep.subr.bf16.mxu1 %v1891_v47  ;;  %v576_v47 = vld [vmem:[#allocation7 + $0x7b0] sm:$0xff] }
  0xc2   : > { %v1937_v54 = vpack.c.bf16 %v579_v48, %v576_v47  ;;  %v615_v47 = vld [vmem:[#allocation7 + $0x8e8] sm:$0xff]  ;;  %v566_v48 = vld [vmem:[#allocation7 + $0x760] sm:$0xff]  ;;  %v336_v32 = vld [vmem:[#allocation7 + $0x30] sm:$0xff] }
  0xc4   : > { %1894 = vmatpush1.bf16.msra.mxu1 %v1893_v52  ;;  %v586_v52 = vld [vmem:[#allocation7 + $0x800] sm:$0xff] }
  0xc5   : > { %1896 = vmatprep.subr.bf16.mxu1 %v1895_v53  ;;  %v1975_v53 = vpack.c.bf16 %v593_v50, %v590_v45  ;;  %v1939_v55 = vpack.c.bf16 %v586_v52, %v583_v51  ;;  %v1991_v45 = vpack.c.bf16 %v617_v43, %v614_v42  ;;  %v569_v50 = vld [vmem:[#allocation7 + $0x778] sm:$0xff]  ;;  %v331_v52 = vld [vmem:[#allocation7 + $0x8] sm:$0xff] }
  0xc6   : > { %v1993_v51 = vpack.c.bf16 %v569_v50, %v566_v48  ;;  %v343_v42 = vld [vmem:[#allocation7 + $0x68] sm:$0xff]  ;;  %v342_v50 = vld [vmem:[#allocation7 + $0x60] sm:$0xff] }
  0xc8   : > { %1898 = vmatpush1.bf16.msra.mxu1 %v1897_v56  ;;  %v582_v56 = vld [vmem:[#allocation7 + $0x7e0] sm:$0xff] }
  0xc9   : > { %1964 = vmatprep.subr.bf16.mxu1 %v1963_v23  ;;  %v1941_v60 = vpack.c.bf16 %v585_v57, %v582_v56  ;;  %v383_v56 = vld [vmem:[#allocation7 + $0x1a8] sm:$0xff] }
  0xcb   : > { %799 = vmatmul.mubr.f32.vlgmr.msra.gmra.mrb[4].mxu1 %v2812_v14  ;;  %v568_v14 = vld [vmem:[#allocation7 + $0x770] sm:$0xff] }
  0xcc   : > { %804 = vmatprep.mubr.f32.mxu1 %v2565_v0  ;;  %v562_v0 = vld [vmem:[#allocation7 + $0x740] sm:$0xff]  ;;  %v1927_v18 = vpack.c.bf16 %v568_v14, %v565_v13  ;;  %1966 = vmatpush3.bf16.msra.mxu1 %v1965_v26  ;;  %v548_v13 = vld [vmem:[#allocation7 + $0x6d0] sm:$0xff]  ;;  %v551_v14 = vld [vmem:[#allocation7 + $0x6e8] sm:$0xff] }
  0xcd   : > { %v1923_v10 = vpack.c.bf16 %v562_v0, %v559_v8  ;;  %1968 = vmatprep.subr.bf16.mxu1 %v1967_v31  ;;  %v1947_v8 = vpack.c.bf16 %v598_v6, %v595_v5  ;;  %v599_v0 = vld [vmem:[#allocation7 + $0x868] sm:$0xff]  ;;  %v557_v26 = vld [vmem:[#allocation7 + $0x718] sm:$0xff] }
  0xce   : > { %v1979_v11 = vpack.c.bf16 %v599_v0, %v596_v7  ;;  %v1985_v27 = vpack.c.bf16 %v557_v26, %v554_v25  ;;  %v340_v25 = vld [vmem:[#allocation7 + $0x50] sm:$0xff]  ;;  %v386_v26 = vld [vmem:[#allocation7 + $0x1c0] sm:$0xff] }
  0xcf   : > { %805 = vmatmul.mubr.f32.gmra.mrb[6].mxu1 %v263_v22  ;;  %1924 = vmatprep.subr.bf16.mxu0 %v1923_v10  ;;  %v574_v22 = vld [vmem:[#allocation7 + $0x7a0] sm:$0xff]  ;;  %v597_v10 = vld [vmem:[#allocation7 + $0x858] sm:$0xff] }
  0xd0   : > { %1926 = vmatpush1.bf16.msra.mxu0 %v1925_v15  ;;  %v1931_v33 = vpack.c.bf16 %v574_v22, %v571_v20  ;;  %1970 = vmatpush3.bf16.msra.mxu1 %v1969_v38  ;;  %v1949_v12 = vpack.c.bf16 %v597_v10, %v594_v9  ;;  %v1981_v15 = vpack.c.bf16 %v551_v14, %v548_v13  ;;  %v605_v20 = vld [vmem:[#allocation7 + $0x898] sm:$0xff]  ;;  %v603_v22 = vld [vmem:[#allocation7 + $0x888] sm:$0xff]  ;;  %v643_v9 = vsub.s32 1, %v2826_v63 }
  0xd1   : > { %1928 = vmatprep.subr.bf16.mxu0 %v1927_v18  ;;  %1972 = vmatprep.subr.bf16.mxu1 %v1971_v41  ;;  %v602_v18 = vld [vmem:[#allocation7 + $0x880] sm:$0xff]  ;;  %v1953_v24 = vpack.c.bf16 %v603_v22, %v600_v21  ;;  %v563_v38 = vld [vmem:[#allocation7 + $0x748] sm:$0xff]  ;;  %v616_v41 = vld [vmem:[#allocation7 + $0x8f0] sm:$0xff] }
  0xd2   : > { %v1983_v23 = vpack.c.bf16 %v605_v20, %v602_v18  ;;  %v1989_v40 = vpack.c.bf16 %v563_v38, %v560_v37  ;;  %v2840_v14 = vrot.slane %v2830_v3, %v643_v9  ;;  %v333_v18 = vld [vmem:[#allocation7 + $0x18] sm:$0xff]  ;;  %v332_v21 = vld [vmem:[#allocation7 + $0x10] sm:$0xff]  ;;  %v335_v22 = vld [vmem:[#allocation7 + $0x28] sm:$0xff] }
  0xd3   : > { %v1997_v30 = vpack.c.bf16 %v333_v18, %v330_v17  ;;  %v339_v38 = vld [vmem:[#allocation7 + $0x48] sm:$0xff]  ;;  %v639_v18 = vsub.s32 0, %v2826_v63 }
  0xd4   : > { %1930 = vmatpush1.bf16.msra.mxu0 %v1929_v29  ;;  %1974 = vmatpush3.bf16.msra.mxu1 %v1973_v49  ;;  %v610_v29 = vld [vmem:[#allocation7 + $0x8c0] sm:$0xff]  ;;  %v2001_v48 = vpack.c.bf16 %v339_v38, %v336_v32  ;;  %v407_v17 = vld [vmem:[#allocation7 + $0x268] sm:$0xff]  ;;  %v413_v32 = vld [vmem:[#allocation7 + $0x298] sm:$0xff] }
  0xd5   : > { %1932 = vmatprep.subr.bf16.mxu0 %v1931_v33  ;;  %1976 = vmatprep.subr.bf16.mxu1 %v1975_v53  ;;  %v1955_v31 = vpack.c.bf16 %v610_v29, %v607_v28  ;;  %v606_v33 = vld [vmem:[#allocation7 + $0x8a0] sm:$0xff]  ;;  %v363_v38 = vld [vmem:[#allocation7 + $0x108] sm:$0xff] }
  0xd6   : > { %v1957_v36 = vpack.c.bf16 %v609_v34, %v606_v33  ;;  %v334_v53 = vld [vmem:[#allocation7 + $0x20] sm:$0xff] }
  0xd8   : > { %1934 = vmatpush1.bf16.msra.mxu0 %v1933_v44  ;;  %1978 = vmatpush3.bf16.msra.mxu1 %v1977_v4  ;;  %v1959_v44 = vpack.c.bf16 %v616_v41, %v613_v39  ;;  %v648_v4 = vrot.slane %v2830_v3, %v647_v1  ;;  %v338_v39 = vld [vmem:[#allocation7 + $0x40] sm:$0xff] }
  0xd9   : > { %1936 = vmatprep.subr.bf16.mxu0 %v1935_v46  ;;  %1980 = vmatprep.subr.bf16.mxu1 %v1979_v11  ;;  %v612_v46 = vld [vmem:[#allocation7 + $0x8d0] sm:$0xff] }
  0xda   : > { %v1961_v49 = vpack.c.bf16 %v615_v47, %v612_v46  ;;  %v395_v46 = vld [vmem:[#allocation7 + $0x208] sm:$0xff] }
  0xdc   : > { %1938 = vmatpush1.bf16.msra.mxu0 %v1937_v54  ;;  %1982 = vmatpush3.bf16.msra.mxu1 %v1981_v15  ;;  %v380_v54 = vld [vmem:[#allocation7 + $0x190] sm:$0xff] }
  0xdd   : > { %1940 = vmatprep.subr.bf16.mxu0 %v1939_v55  ;;  %1984 = vmatprep.subr.bf16.mxu1 %v1983_v23  ;;  %v1995_v55 = vpack.c.bf16 %v334_v53, %v331_v52  ;;  %v2123_v57 = vpack.c.bf16 %v383_v56, %v380_v54  ;;  %v337_v23 = vld [vmem:[#allocation7 + $0x38] sm:$0xff]  ;;  %v344_v52 = vld [vmem:[#allocation7 + $0x70] sm:$0xff]  ;;  %v347_v53 = vld [vmem:[#allocation7 + $0x88] sm:$0xff] }
  0xde   : > { %v349_v54 = vld [vmem:[#allocation7 + $0x98] sm:$0xff] }
  0xe0   : > { %1942 = vmatpush1.bf16.msra.mxu0 %v1941_v60  ;;  %1986 = vmatpush3.bf16.msra.mxu1 %v1985_v27  ;;  %v389_v27 = vld [vmem:[#allocation7 + $0x1d8] sm:$0xff] }
  0xe1   : > { %1944 = vmatprep.subr.bf16.mxu0 %v1943_v61  ;;  %1988 = vmatprep.subr.bf16.mxu1 %v1987_v35  ;;  %v1999_v35 = vpack.c.bf16 %v340_v25, %v337_v23  ;;  %v357_v23 = vld [vmem:[#allocation7 + $0xd8] sm:$0xff] }
  0xe4   : > { %1946 = vmatpush1.bf16.msra.mxu0 %v1945_v2  ;;  %1990 = vmatpush3.bf16.msra.mxu1 %v1989_v40  ;;  %v651_v2 = vsub.s32 3, %v2826_v63  ;;  %v341_v40 = vld [vmem:[#allocation7 + $0x58] sm:$0xff] }
  0xe5   : > { %1948 = vmatprep.subr.bf16.mxu0 %v1947_v8  ;;  %1992 = vmatprep.subr.bf16.mxu1 %v1991_v45  ;;  %v392_v45 = vld [vmem:[#allocation7 + $0x1f0] sm:$0xff] }
  0xe6   : > { %v652_v5 = vrot.slane %v2830_v3, %v651_v2  ;;  %v2131_v56 = vpack.c.bf16 %v395_v46, %v392_v45  ;;  %v416_v45 = vld [vmem:[#allocation7 + $0x2b0] sm:$0xff]  ;;  %v419_v46 = vld [vmem:[#allocation7 + $0x2c8] sm:$0xff] }
  0xe8   : > { %1950 = vmatpush1.bf16.msra.mxu0 %v1949_v12  ;;  %1994 = vmatpush3.bf16.msra.mxu1 %v1993_v51  ;;  %v345_v51 = vld [vmem:[#allocation7 + $0x78] sm:$0xff] }
  0xe9   : > { %1952 = vmatprep.subr.bf16.mxu0 %v1951_v19  ;;  %2124 = vmatprep.subr.bf16.mxu1 %v2123_v57  ;;  %v352_v57 = vld [vmem:[#allocation7 + $0xb0] sm:$0xff] }
  0xec   : > { %1954 = vmatpush1.bf16.msra.mxu0 %v1953_v24 }
  0xed   : > { %1956 = vmatprep.subr.bf16.mxu0 %v1955_v31  ;;  %v2125_v31 = vpack.c.bf16 %v335_v22, %v332_v21  ;;  %v354_v22 = vld [vmem:[#allocation7 + $0xc0] sm:$0xff] }
  0xf0   : > { %1958 = vmatpush1.bf16.msra.mxu0 %v1957_v36  ;;  %v2127_v36 = vpack.c.bf16 %v389_v27, %v386_v26  ;;  %v356_v26 = vld [vmem:[#allocation7 + $0xd0] sm:$0xff]  ;;  %v359_v27 = vld [vmem:[#allocation7 + $0xe8] sm:$0xff] }
  0xf1   : > { %1960 = vmatprep.subr.bf16.mxu0 %v1959_v44  ;;  %v346_v44 = vld [vmem:[#allocation7 + $0x80] sm:$0xff] }
  0xf4   : > { %1962 = vmatpush1.bf16.msra.mxu0 %v1961_v49  ;;  %v2129_v49 = vpack.c.bf16 %v341_v40, %v338_v39 }
  0xf5   : > { %1996 = vmatprep.subr.bf16.mxu0 %v1995_v55  ;;  %v2003_v55 = vpack.c.bf16 %v346_v44, %v343_v42  ;;  %v365_v42 = vld [vmem:[#allocation7 + $0x118] sm:$0xff]  ;;  %v370_v44 = vld [vmem:[#allocation7 + $0x140] sm:$0xff] }
 0x17e   : > { %v2820_v58 = vpop.f32.mrb[0].mxu1 }
 0x17f   : > { %v725_v59 = vpop.f32.mrb[1].mxu1 }
 0x180   : > { %v726_v15 = vadd.f32 %v725_v59, %v2840_v14  ;;  %v398_v59 = vld [vmem:[#allocation7 + $0x220] sm:$0xff] }
 0x182   : > { %v2822_v60 = vpop.f32.mrb[2].mxu1 }
 0x183   : > { %v2824_v61 = vpop.f32.mrb[3].mxu1 }
 0x19e   : > { %v800_v6 = vpop.f32.mrb[4].mxu1 }
 0x19f   : > { %v801_v7 = vadd.f32 %v800_v6, %v648_v4  ;;  %v802_v8 = vpop.f32.mrb[5].mxu1  ;;  %v348_v6 = vld [vmem:[#allocation7 + $0x90] sm:$0xff] }
 0x1a0   : > { %v803_v0 = vadd.f32 %v802_v8, %v652_v5  ;;  %v2007_v8 = vpack.c.bf16 %v352_v57, %v349_v54  ;;  %v368_v54 = vld [vmem:[#allocation7 + $0x130] sm:$0xff] }
 0x1a1   : > { %2345 = vtanh.f32 %v801_v7  ;;  %v351_v7 = vld [vmem:[#allocation7 + $0xa8] sm:$0xff]  ;;  %v376_v57 = vld [vmem:[#allocation7 + $0x170] sm:$0xff] }
 0x1a2   : > { %2347 = vtanh.f32 %v803_v0  ;;  %v806_v10 = vpop.f32.mrb[6].mxu1  ;;  %v2135_v0 = vpack.c.bf16 %v401_v62, %v398_v59  ;;  %v422_v59 = vld [vmem:[#allocation7 + $0x2e0] sm:$0xff]  ;;  %v425_v62 = vld [vmem:[#allocation7 + $0x2f8] sm:$0xff] }
 0x1a3   : > { %v807_v11 = vadd.f32 %v806_v10, %v648_v4  ;;  %v808_v12 = vpop.f32.mrb[7].mxu1  ;;  %v2005_v4 = vpack.c.bf16 %v345_v51, %v342_v50  ;;  %v350_v10 = vld [vmem:[#allocation7 + $0xa0] sm:$0xff]  ;;  %v369_v50 = vld [vmem:[#allocation7 + $0x138] sm:$0xff]  ;;  %v732_v51 = vadd.f32 %v2824_v61, %v2840_v14  ;;  %v2151_v14 = vpack.c.bf16 %v425_v62, %v422_v59  ;;  %v396_v62 = vld [vmem:[#allocation7 + $0x210] sm:$0xff] }
 0x1a4   : > { %v809_v13 = vadd.f32 %v808_v12, %v652_v5  ;;  %v2133_v5 = vpack.c.bf16 %v347_v53, %v344_v52  ;;  %v355_v12 = vld [vmem:[#allocation7 + $0xc8] sm:$0xff]  ;;  %v2147_v53 = vpack.c.bf16 %v419_v46, %v416_v45 }
 0x1a5   : > { %2349 = vtanh.f32 %v807_v11  ;;  %v353_v11 = vld [vmem:[#allocation7 + $0xb8] sm:$0xff] }
 0x1a6   : > { %2351 = vtanh.f32 %v809_v13  ;;  %v358_v13 = vld [vmem:[#allocation7 + $0xe0] sm:$0xff]  ;;  %v2137_v21 = vpack.c.bf16 %v353_v11, %v350_v10  ;;  %v476_v11 = vld [vmem:[#allocation7 + $0x490] sm:$0xff] }
 0x1a7   : > { %2353 = vtanh.f32 %v726_v15  ;;  %v404_v15 = vld [vmem:[#allocation7 + $0x250] sm:$0xff]  ;;  %v382_v10 = vld [vmem:[#allocation7 + $0x1a0] sm:$0xff] }
 0x1a8   : > { %v2139_v25 = vpack.c.bf16 %v407_v17, %v404_v15 }
 0x1ab   : > { %v2843_v16 = vpop.eup %2345 }
 0x1ac   : > { %v2845_v19 = vpop.eup %2347  ;;  %v819_v20 = vmul.f32 %v2843_v16, %v2843_v16 }
 0x1ad   : > { %v820_v24 = vmul.f32 %v2845_v19, %v2845_v19 }
 0x1ae   : > { %v823_v34 = vsub.f32 1.0, %v819_v20  ;;  %v2009_v20 = vpack.c.bf16 %v351_v7, %v348_v6  ;;  %v375_v6 = vld [vmem:[#allocation7 + $0x168] sm:$0xff]  ;;  %v374_v7 = vld [vmem:[#allocation7 + $0x160] sm:$0xff] }
 0x1af   : > { %v2851_v28 = vpop.eup %2349  ;;  %v824_v29 = vsub.f32 1.0, %v820_v24  ;;  %v2011_v24 = vpack.c.bf16 %v358_v13, %v355_v12  ;;  %v479_v12 = vld [vmem:[#allocation7 + $0x4a8] sm:$0xff] }
 0x1b0   : > { %v2853_v33 = vpop.eup %2351  ;;  %v821_v37 = vmul.f32 %v2851_v28, %v2851_v28  ;;  %v2155_v17 = vpack.c.bf16 %v479_v12, %v476_v11  ;;  %v402_v11 = vld [vmem:[#allocation7 + $0x240] sm:$0xff]  ;;  %v405_v12 = vld [vmem:[#allocation7 + $0x258] sm:$0xff] }
 0x1b1   : > { %891 = vmatprep.mubr.f32.mxu0 %v824_v29  ;;  %968 = vmatprep.mubr.f32.mxu1 %v824_v29  ;;  %v822_v41 = vmul.f32 %v2853_v33, %v2853_v33  ;;  %v2354_v2 = vpop.eup %2353  ;;  %v361_v29 = vld [vmem:[#allocation7 + $0xf8] sm:$0xff] }
 0x1b2   : > { %892 = vmatmul.mubr.f32.vlgmr.msra.gmra.mrb[0].mxu0 %v823_v34  ;;  %969 = vmatmul.mubr.f32.vlgmr.msra.gmra.mrb[8].mxu1 %v823_v34  ;;  %v825_v43 = vsub.f32 1.0, %v821_v37  ;;  %v640_v34 = vrot.slane %v2830_v3, %v639_v18  ;;  %v360_v37 = vld [vmem:[#allocation7 + $0xf0] sm:$0xff] }
 0x1b3   : > { %1998 = vmatpush1.bf16.msra.mxu0 %v1997_v30  ;;  %2126 = vmatpush3.bf16.msra.mxu1 %v2125_v31  ;;  %v826_v47 = vsub.f32 1.0, %v822_v41  ;;  %v364_v30 = vld [vmem:[#allocation7 + $0x110] sm:$0xff]  ;;  %v410_v31 = vld [vmem:[#allocation7 + $0x280] sm:$0xff]  ;;  %v2017_v3 = vpack.c.bf16 %v363_v38, %v360_v37  ;;  %v437_v38 = vld [vmem:[#allocation7 + $0x358] sm:$0xff] }
 0x1b4   : > { %2000 = vmatprep.subr.bf16.mxu0 %v1999_v35  ;;  %2128 = vmatprep.subr.bf16.mxu1 %v2127_v36  ;;  %v2013_v35 = vpack.c.bf16 %v357_v23, %v354_v22  ;;  %v2141_v36 = vpack.c.bf16 %v359_v27, %v356_v26  ;;  %v2015_v39 = vpack.c.bf16 %v364_v30, %v361_v29  ;;  %v362_v41 = vld [vmem:[#allocation7 + $0x100] sm:$0xff]  ;;  %v428_v22 = vld [vmem:[#allocation7 + $0x310] sm:$0xff]  ;;  %v431_v23 = vld [vmem:[#allocation7 + $0x328] sm:$0xff] }
 0x1b5   : > { %897 = vmatprep.mubr.f32.mxu0 %v826_v47  ;;  %973 = vmatprep.mubr.f32.mxu1 %v826_v47  ;;  %v2143_v40 = vpack.c.bf16 %v413_v32, %v410_v31  ;;  %v724_v47 = vadd.f32 %v2820_v58, %v640_v34  ;;  %v730_v58 = vadd.f32 %v2822_v60, %v640_v34  ;;  %v482_v26 = vld [vmem:[#allocation7 + $0x4c0] sm:$0xff]  ;;  %v485_v27 = vld [vmem:[#allocation7 + $0x4d8] sm:$0xff]  ;;  %v384_v32 = vld [vmem:[#allocation7 + $0x1b0] sm:$0xff] }
 0x1b6   : > { %898 = vmatmul.mubr.f32.gmra.mrb[2].mxu0 %v825_v43  ;;  %974 = vmatmul.mubr.f32.gmra.mrb[10].mxu1 %v825_v43  ;;  %v367_v43 = vld [vmem:[#allocation7 + $0x128] sm:$0xff]  ;;  %v2157_v30 = vpack.c.bf16 %v431_v23, %v428_v22  ;;  %v2159_v37 = vpack.c.bf16 %v485_v27, %v482_v26  ;;  %v509_v22 = vld [vmem:[#allocation7 + $0x598] sm:$0xff]  ;;  %v2045_v23 = vpack.c.bf16 %v405_v12, %v402_v11  ;;  %v408_v26 = vld [vmem:[#allocation7 + $0x270] sm:$0xff] }
 0x1b7   : > { %2002 = vmatpush1.bf16.msra.mxu0 %v2001_v48  ;;  %2130 = vmatpush3.bf16.msra.mxu1 %v2129_v49  ;;  %v2145_v48 = vpack.c.bf16 %v365_v42, %v362_v41  ;;  %v366_v49 = vld [vmem:[#allocation7 + $0x120] sm:$0xff]  ;;  %v2019_v52 = vpack.c.bf16 %v370_v44, %v367_v43  ;;  %2355 = vtanh.f32 %v724_v47  ;;  %v387_v34 = vld [vmem:[#allocation7 + $0x1c8] sm:$0xff]  ;;  %v488_v42 = vld [vmem:[#allocation7 + $0x4f0] sm:$0xff] }
 0x1b8   : > { %1043 = vmatprep.mubr.f32.mxu0 %v2354_v2  ;;  %1197 = vmatprep.mubr.f32.mxu1 %v2354_v2  ;;  %v2021_v2 = vpack.c.bf16 %v369_v50, %v366_v49  ;;  %2357 = vtanh.f32 %v732_v51  ;;  %v491_v43 = vld [vmem:[#allocation7 + $0x508] sm:$0xff]  ;;  %v2033_v44 = vpack.c.bf16 %v387_v34, %v384_v32  ;;  %v390_v47 = vld [vmem:[#allocation7 + $0x1e0] sm:$0xff] }
 0x1b9   : > { %2004 = vmatprep.subr.bf16.mxu0 %v2003_v55  ;;  %2132 = vmatprep.subr.bf16.mxu1 %v2131_v56  ;;  %v371_v55 = vld [vmem:[#allocation7 + $0x148] sm:$0xff]  ;;  %v373_v56 = vld [vmem:[#allocation7 + $0x158] sm:$0xff]  ;;  %2359 = vtanh.f32 %v730_v58  ;;  %v2163_v50 = vpack.c.bf16 %v491_v43, %v488_v42  ;;  %v418_v34 = vld [vmem:[#allocation7 + $0x2c0] sm:$0xff] }
 0x1ba   : > { %v2023_v61 = vpack.c.bf16 %v376_v57, %v373_v56  ;;  %v443_v51 = vld [vmem:[#allocation7 + $0x388] sm:$0xff]  ;;  %v414_v42 = vld [vmem:[#allocation7 + $0x2a0] sm:$0xff]  ;;  %v417_v43 = vld [vmem:[#allocation7 + $0x2b8] sm:$0xff] }
 0x1bb   : > { %2006 = vmatpush1.bf16.msra.mxu0 %v2005_v4  ;;  %2134 = vmatpush3.bf16.msra.mxu1 %v2133_v5  ;;  %v2149_v4 = vpack.c.bf16 %v371_v55, %v368_v54  ;;  %v372_v5 = vld [vmem:[#allocation7 + $0x150] sm:$0xff]  ;;  %v494_v54 = vld [vmem:[#allocation7 + $0x520] sm:$0xff]  ;;  %v497_v55 = vld [vmem:[#allocation7 + $0x538] sm:$0xff] }
 0x1bc   : > { %2008 = vmatprep.subr.bf16.mxu0 %v2007_v8  ;;  %2136 = vmatprep.subr.bf16.mxu1 %v2135_v0  ;;  %v377_v8 = vld [vmem:[#allocation7 + $0x178] sm:$0xff]  ;;  %v379_v0 = vld [vmem:[#allocation7 + $0x188] sm:$0xff]  ;;  %v2025_v60 = vpack.c.bf16 %v375_v6, %v372_v5 }
 0x1bd   : > { %v2153_v13 = vpack.c.bf16 %v377_v8, %v374_v7  ;;  %v2027_v15 = vpack.c.bf16 %v382_v10, %v379_v0  ;;  %v399_v58 = vld [vmem:[#allocation7 + $0x228] sm:$0xff]  ;;  %v449_v5 = vld [vmem:[#allocation7 + $0x3b8] sm:$0xff] }
 0x1be   : > { %v403_v6 = vld [vmem:[#allocation7 + $0x248] sm:$0xff]  ;;  %v2041_v8 = vpack.c.bf16 %v399_v58, %v396_v62  ;;  %v430_v58 = vld [vmem:[#allocation7 + $0x320] sm:$0xff] }
 0x1bf   : > { %2010 = vmatpush1.bf16.msra.mxu0 %v2009_v20  ;;  %2138 = vmatpush3.bf16.msra.mxu1 %v2137_v21  ;;  %v378_v20 = vld [vmem:[#allocation7 + $0x180] sm:$0xff]  ;;  %v381_v21 = vld [vmem:[#allocation7 + $0x198] sm:$0xff]  ;;  %v503_v7 = vld [vmem:[#allocation7 + $0x568] sm:$0xff] }
 0x1c0   : > { %2012 = vmatprep.subr.bf16.mxu0 %v2011_v24  ;;  %2140 = vmatprep.subr.bf16.mxu1 %v2139_v25  ;;  %v385_v24 = vld [vmem:[#allocation7 + $0x1b8] sm:$0xff]  ;;  %v388_v25 = vld [vmem:[#allocation7 + $0x1d0] sm:$0xff]  ;;  %v2029_v29 = vpack.c.bf16 %v381_v21, %v378_v20  ;;  %v506_v21 = vld [vmem:[#allocation7 + $0x580] sm:$0xff] }
 0x1c1   : > { %v2031_v31 = vpack.c.bf16 %v388_v25, %v385_v24  ;;  %v412_v20 = vld [vmem:[#allocation7 + $0x290] sm:$0xff]  ;;  %v411_v27 = vld [vmem:[#allocation7 + $0x288] sm:$0xff] }
 0x1c2   : > { %v415_v32 = vld [vmem:[#allocation7 + $0x2a8] sm:$0xff] }
 0x1c3   : > { %2014 = vmatpush1.bf16.msra.mxu0 %v2013_v35  ;;  %2142 = vmatpush3.bf16.msra.mxu1 %v2141_v36  ;;  %v434_v35 = vld [vmem:[#allocation7 + $0x340] sm:$0xff]  ;;  %v2867_v36 = vpop.eup %2355  ;;  %v427_v62 = vld [vmem:[#allocation7 + $0x308] sm:$0xff] }
 0x1c4   : > { %2016 = vmatprep.subr.bf16.mxu0 %v2015_v39  ;;  %2144 = vmatprep.subr.bf16.mxu1 %v2143_v40  ;;  %v391_v39 = vld [vmem:[#allocation7 + $0x1e8] sm:$0xff]  ;;  %v394_v40 = vld [vmem:[#allocation7 + $0x200] sm:$0xff]  ;;  %v2869_v41 = vpop.eup %2357  ;;  %v2161_v45 = vpack.c.bf16 %v437_v38, %v434_v35  ;;  %v512_v35 = vld [vmem:[#allocation7 + $0x5b0] sm:$0xff]  ;;  %v2049_v38 = vpack.c.bf16 %v411_v27, %v408_v26 }
 0x1c5   : > { %v2035_v46 = vpack.c.bf16 %v394_v40, %v391_v39  ;;  %v2873_v49 = vpop.eup %2359  ;;  %v2051_v40 = vpack.c.bf16 %v418_v34, %v415_v32  ;;  %v435_v11 = vld [vmem:[#allocation7 + $0x348] sm:$0xff]  ;;  %v454_v26 = vld [vmem:[#allocation7 + $0x3e0] sm:$0xff]  ;;  %v460_v32 = vld [vmem:[#allocation7 + $0x410] sm:$0xff] }
 0x1c6   : > { %v439_v12 = vld [vmem:[#allocation7 + $0x368] sm:$0xff] }
 0x1c7   : > { %2018 = vmatpush1.bf16.msra.mxu0 %v2017_v3  ;;  %2146 = vmatpush3.bf16.msra.mxu1 %v2145_v48  ;;  %v393_v3 = vld [vmem:[#allocation7 + $0x1f8] sm:$0xff]  ;;  %v440_v48 = vld [vmem:[#allocation7 + $0x370] sm:$0xff] }
 0x1c8   : > { %2020 = vmatprep.subr.bf16.mxu0 %v2019_v52  ;;  %2148 = vmatprep.subr.bf16.mxu1 %v2147_v53  ;;  %v397_v52 = vld [vmem:[#allocation7 + $0x218] sm:$0xff]  ;;  %v400_v53 = vld [vmem:[#allocation7 + $0x230] sm:$0xff]  ;;  %v2037_v56 = vpack.c.bf16 %v393_v3, %v390_v47  ;;  %v2165_v57 = vpack.c.bf16 %v443_v51, %v440_v48  ;;  %v518_v48 = vld [vmem:[#allocation7 + $0x5e0] sm:$0xff]  ;;  %v2053_v51 = vpack.c.bf16 %v417_v43, %v414_v42 }
 0x1c9   : > { %v2039_v59 = vpack.c.bf16 %v400_v53, %v397_v52  ;;  %v421_v47 = vld [vmem:[#allocation7 + $0x2d8] sm:$0xff]  ;;  %v424_v3 = vld [vmem:[#allocation7 + $0x2f0] sm:$0xff]  ;;  %v462_v43 = vld [vmem:[#allocation7 + $0x420] sm:$0xff] }
 0x1ca   : > { %v2055_v53 = vpack.c.bf16 %v424_v3, %v421_v47 }
 0x1cb   : > { %2022 = vmatpush1.bf16.msra.mxu0 %v2021_v2  ;;  %2150 = vmatpush3.bf16.msra.mxu1 %v2149_v4  ;;  %v446_v2 = vld [vmem:[#allocation7 + $0x3a0] sm:$0xff]  ;;  %v2167_v4 = vpack.c.bf16 %v497_v55, %v494_v54  ;;  %v420_v54 = vld [vmem:[#allocation7 + $0x2d0] sm:$0xff]  ;;  %v423_v55 = vld [vmem:[#allocation7 + $0x2e8] sm:$0xff] }
 0x1cc   : > { %2024 = vmatprep.subr.bf16.mxu0 %v2023_v61  ;;  %2152 = vmatprep.subr.bf16.mxu1 %v2151_v14  ;;  %v406_v61 = vld [vmem:[#allocation7 + $0x260] sm:$0xff]  ;;  %v500_v14 = vld [vmem:[#allocation7 + $0x550] sm:$0xff]  ;;  %v2169_v0 = vpack.c.bf16 %v449_v5, %v446_v2  ;;  %v2057_v2 = vpack.c.bf16 %v423_v55, %v420_v54  ;;  %v2059_v5 = vpack.c.bf16 %v430_v58, %v427_v62 }
 0x1cd   : > { %v2043_v10 = vpack.c.bf16 %v406_v61, %v403_v6  ;;  %v426_v6 = vld [vmem:[#allocation7 + $0x300] sm:$0xff]  ;;  %v429_v61 = vld [vmem:[#allocation7 + $0x318] sm:$0xff] }
 0x1ce   : > { %v474_v55 = vld [vmem:[#allocation7 + $0x480] sm:$0xff] }
 0x1cf   : > { %2026 = vmatpush1.bf16.msra.mxu0 %v2025_v60  ;;  %2154 = vmatpush3.bf16.msra.mxu1 %v2153_v13  ;;  %v452_v60 = vld [vmem:[#allocation7 + $0x3d0] sm:$0xff]  ;;  %v2171_v13 = vpack.c.bf16 %v503_v7, %v500_v14  ;;  %v433_v14 = vld [vmem:[#allocation7 + $0x338] sm:$0xff] }
 0x1d0   : > { %2028 = vmatprep.subr.bf16.mxu0 %v2027_v15  ;;  %2156 = vmatprep.subr.bf16.mxu1 %v2155_v17  ;;  %v455_v15 = vld [vmem:[#allocation7 + $0x3e8] sm:$0xff]  ;;  %v409_v17 = vld [vmem:[#allocation7 + $0x278] sm:$0xff]  ;;  %v436_v7 = vld [vmem:[#allocation7 + $0x350] sm:$0xff] }
 0x1d1   : > { %v2173_v24 = vpack.c.bf16 %v455_v15, %v452_v60  ;;  %v2047_v25 = vpack.c.bf16 %v412_v20, %v409_v17  ;;  %v442_v60 = vld [vmem:[#allocation7 + $0x380] sm:$0xff]  ;;  %v441_v20 = vld [vmem:[#allocation7 + $0x378] sm:$0xff] }
 0x1d2   : > { %1198 = vmatmul.mubr.f32.vlgmr.msra.gmra.mrb[12].mxu1 %v2867_v36  ;;  %v2067_v15 = vpack.c.bf16 %v442_v60, %v439_v12  ;;  %v438_v17 = vld [vmem:[#allocation7 + $0x360] sm:$0xff]  ;;  %v492_v60 = vld [vmem:[#allocation7 + $0x510] sm:$0xff] }
 0x1d3   : > { %2030 = vmatpush1.bf16.msra.mxu0 %v2029_v29  ;;  %1202 = vmatprep.mubr.f32.mxu1 %v2869_v41  ;;  %v458_v29 = vld [vmem:[#allocation7 + $0x400] sm:$0xff] }
 0x1d4   : > { %2158 = vmatpush3.bf16.msra.mxu1 %v2157_v30  ;;  %2032 = vmatprep.subr.bf16.mxu0 %v2031_v31  ;;  %v2175_v30 = vpack.c.bf16 %v509_v22, %v506_v21  ;;  %v461_v31 = vld [vmem:[#allocation7 + $0x418] sm:$0xff]  ;;  %v448_v22 = vld [vmem:[#allocation7 + $0x3b0] sm:$0xff] }
 0x1d5   : > { %2160 = vmatprep.subr.bf16.mxu1 %v2159_v37  ;;  %v515_v37 = vld [vmem:[#allocation7 + $0x5c8] sm:$0xff]  ;;  %v2177_v39 = vpack.c.bf16 %v461_v31, %v458_v29  ;;  %v445_v21 = vld [vmem:[#allocation7 + $0x398] sm:$0xff] }
 0x1d6   : > { %1203 = vmatmul.mubr.f32.gmra.mrb[14].mxu1 %v2873_v49  ;;  %v457_v31 = vld [vmem:[#allocation7 + $0x3f8] sm:$0xff] }
 0x1d7   : > { %2034 = vmatpush1.bf16.msra.mxu0 %v2033_v44  ;;  %1272 = vmatprep.mubr.f32.mxu1 %v2845_v19  ;;  %v464_v44 = vld [vmem:[#allocation7 + $0x430] sm:$0xff] }
 0x1d8   : > { %2162 = vmatpush3.bf16.msra.mxu1 %v2161_v45  ;;  %2036 = vmatprep.subr.bf16.mxu0 %v2035_v46  ;;  %v2179_v45 = vpack.c.bf16 %v515_v37, %v512_v35  ;;  %v467_v46 = vld [vmem:[#allocation7 + $0x448] sm:$0xff]  ;;  %v456_v35 = vld [vmem:[#allocation7 + $0x3f0] sm:$0xff] }
 0x1d9   : > { %2164 = vmatprep.subr.bf16.mxu1 %v2163_v50  ;;  %v521_v50 = vld [vmem:[#allocation7 + $0x5f8] sm:$0xff]  ;;  %v2181_v52 = vpack.c.bf16 %v467_v46, %v464_v44  ;;  %v459_v37 = vld [vmem:[#allocation7 + $0x408] sm:$0xff]  ;;  %v472_v46 = vld [vmem:[#allocation7 + $0x470] sm:$0xff] }
 0x1da   : > { %v465_v44 = vld [vmem:[#allocation7 + $0x438] sm:$0xff] }
 0x1db   : > { %2038 = vmatpush1.bf16.msra.mxu0 %v2037_v56  ;;  %v470_v56 = vld [vmem:[#allocation7 + $0x460] sm:$0xff]  ;;  %v2085_v47 = vpack.c.bf16 %v465_v44, %v462_v43  ;;  %v620_v43 = vld [vmem:[#allocation8] sm:$0xff] }
 0x1dc   : > { %2166 = vmatpush3.bf16.msra.mxu1 %v2165_v57  ;;  %2040 = vmatprep.subr.bf16.mxu0 %v2039_v59  ;;  %v2183_v57 = vpack.c.bf16 %v521_v50, %v518_v48  ;;  %v473_v59 = vld [vmem:[#allocation7 + $0x478] sm:$0xff]  ;;  %v468_v48 = vld [vmem:[#allocation7 + $0x450] sm:$0xff]  ;;  %v471_v50 = vld [vmem:[#allocation7 + $0x468] sm:$0xff] }
 0x1dd   : > { %2168 = vmatprep.subr.bf16.mxu1 %v2167_v4  ;;  %v2185_v4 = vpack.c.bf16 %v473_v59, %v470_v56  ;;  %v477_v56 = vld [vmem:[#allocation7 + $0x498] sm:$0xff]  ;;  %v484_v59 = vld [vmem:[#allocation7 + $0x4d0] sm:$0xff]  ;;  %v621_v44 = vld [vmem:[#allocation8 + $0x8] sm:$0xff] }
 0x1de   : > { %v2093_v62 = vpack.c.bf16 %v477_v56, %v474_v55  ;;  %v630_v55 = vld [vmem:[#allocation8 + $0x50] sm:$0xff]  ;;  %v631_v56 = vld [vmem:[#allocation8 + $0x58] sm:$0xff] }
 0x1df   : > { %2042 = vmatpush1.bf16.msra.mxu0 %v2041_v8  ;;  %v2061_v8 = vpack.c.bf16 %v429_v61, %v426_v6  ;;  %v490_v6 = vld [vmem:[#allocation7 + $0x500] sm:$0xff] }
 0x1e0   : > { %2170 = vmatpush3.bf16.msra.mxu1 %v2169_v0  ;;  %2044 = vmatprep.subr.bf16.mxu0 %v2043_v10  ;;  %v2063_v0 = vpack.c.bf16 %v436_v7, %v433_v14  ;;  %v432_v10 = vld [vmem:[#allocation7 + $0x330] sm:$0xff]  ;;  %v486_v7 = vld [vmem:[#allocation7 + $0x4e0] sm:$0xff] }
 0x1e1   : > { %2172 = vmatprep.subr.bf16.mxu1 %v2171_v13  ;;  %v2065_v13 = vpack.c.bf16 %v435_v11, %v432_v10  ;;  %v496_v10 = vld [vmem:[#allocation7 + $0x530] sm:$0xff] }
 0x1e3   : > { %2046 = vmatpush1.bf16.msra.mxu0 %v2045_v23  ;;  %v444_v23 = vld [vmem:[#allocation7 + $0x390] sm:$0xff] }
 0x1e4   : > { %2174 = vmatpush3.bf16.msra.mxu1 %v2173_v24  ;;  %2048 = vmatprep.subr.bf16.mxu0 %v2047_v25  ;;  %v447_v24 = vld [vmem:[#allocation7 + $0x3a8] sm:$0xff] }
 0x1e5   : > { %2176 = vmatprep.subr.bf16.mxu1 %v2175_v30  ;;  %v451_v25 = vld [vmem:[#allocation7 + $0x3c8] sm:$0xff]  ;;  %v2073_v27 = vpack.c.bf16 %v447_v24, %v444_v23  ;;  %v450_v30 = vld [vmem:[#allocation7 + $0x3c0] sm:$0xff]  ;;  %v508_v23 = vld [vmem:[#allocation7 + $0x590] sm:$0xff] }
 0x1e6   : > { %v2075_v29 = vpack.c.bf16 %v454_v26, %v451_v25  ;;  %v504_v26 = vld [vmem:[#allocation7 + $0x570] sm:$0xff] }
 0x1e7   : > { %2050 = vmatpush1.bf16.msra.mxu0 %v2049_v38  ;;  %v463_v38 = vld [vmem:[#allocation7 + $0x428] sm:$0xff] }
 0x1e8   : > { %2178 = vmatpush3.bf16.msra.mxu1 %v2177_v39  ;;  %2052 = vmatprep.subr.bf16.mxu0 %v2051_v40  ;;  %v466_v39 = vld [vmem:[#allocation7 + $0x440] sm:$0xff]  ;;  %v2081_v40 = vpack.c.bf16 %v459_v37, %v456_v35  ;;  %v520_v35 = vld [vmem:[#allocation7 + $0x5f0] sm:$0xff] }
 0x1e9   : > { %2180 = vmatprep.subr.bf16.mxu1 %v2179_v45  ;;  %v2083_v42 = vpack.c.bf16 %v466_v39, %v463_v38  ;;  %v469_v45 = vld [vmem:[#allocation7 + $0x458] sm:$0xff]  ;;  %v516_v39 = vld [vmem:[#allocation7 + $0x5d0] sm:$0xff] }
 0x1ea   : > { %v2087_v3 = vpack.c.bf16 %v472_v46, %v469_v45  ;;  %v622_v45 = vld [vmem:[#allocation8 + $0x10] sm:$0xff]  ;;  %v2887_v46 = vpack.c.bf16 %v621_v44, %v620_v43 }
 0x1eb   : > { %2054 = vmatpush1.bf16.msra.mxu0 %v2053_v51  ;;  %v475_v51 = vld [vmem:[#allocation7 + $0x488] sm:$0xff] }
 0x1ec   : > { %2182 = vmatpush3.bf16.msra.mxu1 %v2181_v52  ;;  %2056 = vmatprep.subr.bf16.mxu0 %v2055_v53  ;;  %v478_v52 = vld [vmem:[#allocation7 + $0x4a0] sm:$0xff]  ;;  %v2089_v53 = vpack.c.bf16 %v471_v50, %v468_v48  ;;  %v624_v48 = vld [vmem:[#allocation8 + $0x20] sm:$0xff] }
 0x1ed   : > { %2184 = vmatprep.subr.bf16.mxu1 %v2183_v57  ;;  %v2091_v54 = vpack.c.bf16 %v478_v52, %v475_v51  ;;  %v481_v57 = vld [vmem:[#allocation7 + $0x4b8] sm:$0xff]  ;;  %v625_v50 = vld [vmem:[#allocation8 + $0x28] sm:$0xff] }
 0x1ee   : > { %v2095_v58 = vpack.c.bf16 %v484_v59, %v481_v57  ;;  %v628_v52 = vld [vmem:[#allocation8 + $0x40] sm:$0xff]  ;;  %v2906_v57 = vpack.c.bf16 %v631_v56, %v630_v55 }
 0x1ef   : > { %2058 = vmatpush1.bf16.msra.mxu0 %v2057_v2  ;;  %v480_v2 = vld [vmem:[#allocation7 + $0x4b0] sm:$0xff]  ;;  %v632_v59 = vld [vmem:[#allocation8 + $0x60] sm:$0xff] }
 0x1f0   : > { %2186 = vmatpush3.bf16.msra.mxu1 %v2185_v4  ;;  %2060 = vmatprep.subr.bf16.mxu0 %v2059_v5  ;;  %v483_v4 = vld [vmem:[#allocation7 + $0x4c8] sm:$0xff] }
 0x1f1   : > { %v487_v5 = vld [vmem:[#allocation7 + $0x4e8] sm:$0xff]  ;;  %v2097_v61 = vpack.c.bf16 %v483_v4, %v480_v2  ;;  %2188 = vmatprep.subr.bf16.mxu1 %v2887_v46 }
 0x1f2   : > { %1044 = vmatmul.mubr.f32.vlgmr.msra.gmra.mrb[0].mxu0 %v2867_v36  ;;  %v2069_v36 = vpack.c.bf16 %v441_v20, %v438_v17  ;;  %v2099_v14 = vpack.c.bf16 %v490_v6, %v487_v5  ;;  %v502_v17 = vld [vmem:[#allocation7 + $0x560] sm:$0xff]  ;;  %v634_v6 = vld [vmem:[#allocation8 + $0x70] sm:$0xff] }
 0x1f3   : > { %1273 = vmatmul.mubr.f32.vlgmr.msra.gmra.mrb[16].mxu1 %v2843_v16  ;;  %1049 = vmatprep.mubr.f32.mxu0 %v2869_v41  ;;  %v2071_v41 = vpack.c.bf16 %v448_v22, %v445_v21  ;;  %v498_v22 = vld [vmem:[#allocation7 + $0x540] sm:$0xff] }
 0x1f4   : > { %2062 = vmatpush1.bf16.msra.mxu0 %v2061_v8  ;;  %1277 = vmatprep.mubr.f32.mxu1 %v2853_v33  ;;  %v489_v8 = vld [vmem:[#allocation7 + $0x4f8] sm:$0xff] }
 0x1f5   : > { %2064 = vmatprep.subr.bf16.mxu0 %v2063_v0  ;;  %v493_v0 = vld [vmem:[#allocation7 + $0x518] sm:$0xff]  ;;  %v2101_v11 = vpack.c.bf16 %v489_v8, %v486_v7  ;;  %2190 = vmatpush3.bf16.msra.mxu1 %v2887_v46 }
 0x1f6   : > { %1050 = vmatmul.mubr.f32.gmra.mrb[2].mxu0 %v2873_v49  ;;  %v453_v49 = vld [vmem:[#allocation7 + $0x3d8] sm:$0xff]  ;;  %v2103_v12 = vpack.c.bf16 %v496_v10, %v493_v0 }
 0x1f7   : > { %1278 = vmatmul.mubr.f32.gmra.mrb[18].mxu1 %v2851_v28  ;;  %1120 = vmatprep.mubr.f32.mxu0 %v2845_v19  ;;  %v2077_v34 = vpack.c.bf16 %v453_v49, %v450_v30  ;;  %v2079_v19 = vpack.c.bf16 %v460_v32, %v457_v31  ;;  %v514_v30 = vld [vmem:[#allocation7 + $0x5c0] sm:$0xff] }
 0x1f8   : > { %2066 = vmatpush1.bf16.msra.mxu0 %v2065_v13  ;;  %v495_v13 = vld [vmem:[#allocation7 + $0x528] sm:$0xff]  ;;  %v510_v32 = vld [vmem:[#allocation7 + $0x5a0] sm:$0xff] }
 0x1f9   : > { %2068 = vmatprep.subr.bf16.mxu0 %v2067_v15  ;;  %v499_v15 = vld [vmem:[#allocation7 + $0x548] sm:$0xff]  ;;  %v2105_v20 = vpack.c.bf16 %v495_v13, %v492_v60 }
 0x1fa   : > { %v2107_v21 = vpack.c.bf16 %v502_v17, %v499_v15 }
 0x1fc   : > { %2070 = vmatpush1.bf16.msra.mxu0 %v2069_v36  ;;  %v501_v36 = vld [vmem:[#allocation7 + $0x558] sm:$0xff] }
 0x1fd   : > { %2072 = vmatprep.subr.bf16.mxu0 %v2071_v41  ;;  %v505_v41 = vld [vmem:[#allocation7 + $0x578] sm:$0xff]  ;;  %v2109_v24 = vpack.c.bf16 %v501_v36, %v498_v22 }
 0x1fe   : > { %v2111_v25 = vpack.c.bf16 %v508_v23, %v505_v41 }
 0x200   : > { %2074 = vmatpush1.bf16.msra.mxu0 %v2073_v27  ;;  %v507_v27 = vld [vmem:[#allocation7 + $0x588] sm:$0xff] }
 0x201   : > { %2076 = vmatprep.subr.bf16.mxu0 %v2075_v29  ;;  %v511_v29 = vld [vmem:[#allocation7 + $0x5a8] sm:$0xff]  ;;  %v2113_v49 = vpack.c.bf16 %v507_v27, %v504_v26 }
 0x202   : > { %v2115_v31 = vpack.c.bf16 %v514_v30, %v511_v29 }
 0x204   : > { %2078 = vmatpush1.bf16.msra.mxu0 %v2077_v34  ;;  %v513_v34 = vld [vmem:[#allocation7 + $0x5b8] sm:$0xff] }
 0x205   : > { %2080 = vmatprep.subr.bf16.mxu0 %v2079_v19  ;;  %v517_v19 = vld [vmem:[#allocation7 + $0x5d8] sm:$0xff]  ;;  %v2117_v37 = vpack.c.bf16 %v513_v34, %v510_v32 }
 0x206   : > { %v2119_v38 = vpack.c.bf16 %v520_v35, %v517_v19 }
 0x208   : > { %2082 = vmatpush1.bf16.msra.mxu0 %v2081_v40  ;;  %v519_v40 = vld [vmem:[#allocation7 + $0x5e8] sm:$0xff] }
 0x209   : > { %2084 = vmatprep.subr.bf16.mxu0 %v2083_v42  ;;  %v2121_v42 = vpack.c.bf16 %v519_v40, %v516_v39 }
 0x20c   : > { %2086 = vmatpush1.bf16.msra.mxu0 %v2085_v47  ;;  %v623_v47 = vld [vmem:[#allocation8 + $0x18] sm:$0xff] }
 0x20d   : > { %2088 = vmatprep.subr.bf16.mxu0 %v2087_v3  ;;  %v2889_v3 = vpack.c.bf16 %v623_v47, %v622_v45 }
 0x20f   : > { %2192 = vmatprep.subr.bf16.mxu1 %v2889_v3 }
 0x210   : > { %2090 = vmatpush1.bf16.msra.mxu0 %v2089_v53  ;;  %2194 = vmatpush3.bf16.msra.mxu1 %v2889_v3  ;;  %v629_v53 = vld [vmem:[#allocation8 + $0x48] sm:$0xff] }
 0x211   : > { %2092 = vmatprep.subr.bf16.mxu0 %v2091_v54  ;;  %v2902_v54 = vpack.c.bf16 %v629_v53, %v628_v52 }
 0x214   : > { %2094 = vmatpush1.bf16.msra.mxu0 %v2093_v62  ;;  %v633_v62 = vld [vmem:[#allocation8 + $0x68] sm:$0xff] }
 0x215   : > { %2096 = vmatprep.subr.bf16.mxu0 %v2095_v58  ;;  %v2211_v2 = vpack.c.bf16 %v633_v62, %v632_v59 }
 0x218   : > { %2098 = vmatpush1.bf16.msra.mxu0 %v2097_v61  ;;  %v635_v61 = vld [vmem:[#allocation8 + $0x78] sm:$0xff] }
 0x219   : > { %2100 = vmatprep.subr.bf16.mxu0 %v2099_v14  ;;  %v2215_v7 = vpack.c.bf16 %v635_v61, %v634_v6 }
 0x21c   : > { %2102 = vmatpush1.bf16.msra.mxu0 %v2101_v11 }
 0x21d   : > { %2104 = vmatprep.subr.bf16.mxu0 %v2103_v12 }
 0x220   : > { %2106 = vmatpush1.bf16.msra.mxu0 %v2105_v20 }
 0x221   : > { %2108 = vmatprep.subr.bf16.mxu0 %v2107_v21  ;;  %v619_v21 = vld [vmem:[#allocation7 + $0x900] ss:$8 sm:$0x7] }
 0x222   : > { %v1295_v23 = vrot.slane %v619_v21, %v647_v1  ;;  %v1291_v32 = vrot.slane %v619_v21, %v643_v9 }
 0x224   : > { %2110 = vmatpush1.bf16.msra.mxu0 %v2109_v24 }
 0x225   : > { %2112 = vmatprep.subr.bf16.mxu0 %v2111_v25 }
 0x228   : > { %2114 = vmatpush1.bf16.msra.mxu0 %v2113_v49 }
 0x229   : > { %2116 = vmatprep.subr.bf16.mxu0 %v2115_v31  ;;  %v1287_v31 = vrot.slane %v619_v21, %v639_v18 }
 0x22c   : > { %2118 = vmatpush1.bf16.msra.mxu0 %v2117_v37 }
 0x22d   : > { %2120 = vmatprep.subr.bf16.mxu0 %v2119_v38 }
 0x230   : > { %2122 = vmatpush1.bf16.msra.mxu0 %v2121_v42 }
 0x233   : > { %1121 = vmatmul.mubr.f32.vlgmr.msra.gmra.mrb[0].mxu0 %v2843_v16  ;;  %v2894_v16 = vpack.c.bf16 %v625_v50, %v624_v48 }
 0x234   : > { %1126 = vmatprep.mubr.f32.mxu0 %v2853_v33  ;;  %v626_v33 = vld [vmem:[#allocation8 + $0x30] sm:$0xff] }
 0x235   : > { %2196 = vmatprep.subr.bf16.mxu1 %v2894_v16 }
 0x236   : > { %2198 = vmatpush3.bf16.msra.mxu1 %v2894_v16 }
 0x237   : > { %1127 = vmatmul.mubr.f32.gmra.mrb[2].mxu0 %v2851_v28  ;;  %v627_v28 = vld [vmem:[#allocation8 + $0x38] sm:$0xff] }
 0x238   : > { %v2898_v51 = vpack.c.bf16 %v627_v28, %v626_v33 }
 0x23a   : > { %2200 = vmatprep.subr.bf16.mxu1 %v2898_v51 }
 0x23b   : > { %2202 = vmatpush3.bf16.msra.mxu1 %v2898_v51 }
 0x23c   : > { %2204 = vmatprep.subr.bf16.mxu1 %v2902_v54 }
 0x23f   : > { %2206 = vmatpush3.bf16.msra.mxu1 %v2902_v54 }
 0x240   : > { %2208 = vmatprep.subr.bf16.mxu1 %v2906_v57 }
 0x243   : > { %2210 = vmatpush3.bf16.msra.mxu1 %v2906_v57 }
 0x244   : > { %2212 = vmatprep.subr.bf16.mxu1 %v2211_v2 }
 0x247   : > { %2214 = vmatpush3.bf16.msra.mxu1 %v2211_v2 }
 0x248   : > { %2216 = vmatprep.subr.bf16.mxu1 %v2215_v7 }
 0x24b   : > { %2218 = vmatpush3.bf16.msra.mxu1 %v2215_v7 }
 0x24c   : > { %2220 = vmatprep.subr.bf16.mxu1 %v2887_v46 }
 0x285   : > { %v1647_v58 = vpop.f32.mrb[8].mxu1 }
 0x286   : > { %v1648_v4 = vpop.f32.mrb[9].mxu1 }
 0x287   : > { %v1649_v5 = vadd.f32 %v1648_v4, %v1647_v58 }
 0x289   : > { %v1650_v14 = vpop.f32.mrb[10].mxu1 }
 0x28a   : > { %v1651_v8 = vpop.f32.mrb[11].mxu1 }
 0x28b   : > { %v1652_v0 = vadd.f32 %v1651_v8, %v1650_v14 }
 0x2a5   : > { %v1685_v10 = vpop.f32.mrb[12].mxu1 }
 0x2a6   : > { %v1686_v11 = vpop.f32.mrb[13].mxu1 }
 0x2a7   : > { %v1687_v12 = vadd.f32 %v1686_v11, %v1685_v10 }
 0x2a9   : > { %v1200_v60 = vadd.f32 %v1687_v12, %v1649_v5  ;;  %v1688_v13 = vpop.f32.mrb[14].mxu1 }
 0x2aa   : > { %v1689_v15 = vpop.f32.mrb[15].mxu1 }
 0x2ab   : > { %v1690_v17 = vadd.f32 %v1689_v15, %v1688_v13 }
 0x2ad   : > { %v1205_v20 = vadd.f32 %v1690_v17, %v1652_v0 }
 0x2c6   : > { %v1723_v22 = vpop.f32.mrb[16].mxu1 }
 0x2c7   : > { %v1724_v36 = vpop.f32.mrb[17].mxu1 }
 0x2c8   : > { %v1725_v41 = vadd.f32 %v1724_v36, %v1723_v22 }
 0x2ca   : > { %v1275_v24 = vadd.f32 %v1725_v41, %v1200_v60  ;;  %v1726_v25 = vpop.f32.mrb[18].mxu1 }
 0x2cb   : > { %v1727_v26 = vpop.f32.mrb[19].mxu1 }
 0x2cc   : > { %v1728_v27 = vadd.f32 %v1727_v26, %v1726_v25  ;;  %v1301_v29 = vadd.f32 %v1295_v23, %v1275_v24 }
 0x2ce   : > { %v1280_v30 = vadd.f32 %v1728_v27, %v1205_v20 }
 0x2d0   : > { %v1304_v49 = vadd.f32 %v1295_v23, %v1280_v30 }
 0x306   : > { %v1122_v34 = vpop.f32.mrb[0].mxu0 }
 0x307   : > { %v1299_v19 = vadd.f32 %v1287_v31, %v1122_v34  ;;  %v1124_v35 = vpop.f32.mrb[1].mxu0 }
 0x308   : > { %v1300_v37 = vadd.f32 %v1291_v32, %v1124_v35 }
 0x30a   : > { %v1128_v38 = vpop.f32.mrb[2].mxu0  ;;  %v1305_v39 = vmul.f32 %v1300_v37, %v1299_v19  ;;  %v1384_v44 = vmul.f32 %v1300_v37, %v1300_v37 }
 0x30b   : > { %v1302_v1 = vadd.f32 %v1287_v31, %v1128_v38  ;;  %v1130_v40 = vpop.f32.mrb[3].mxu0 }
 0x30c   : > { %v1303_v42 = vadd.f32 %v1291_v32, %v1130_v40  ;;  %1797 = vmatprep.mubr.f32.mxu1 %v1305_v39 }
 0x30e   : > { %v1306_v43 = vmul.f32 %v1303_v42, %v1302_v1  ;;  %v1385_v63 = vmul.f32 %v1303_v42, %v1303_v42 }
 0x310   : > { %1798 = vmatmul.mubr.f32.vlgmr.msra.gmra.mrb[20].mxu1 %v1306_v43 }
 0x311   : > { %2222 = vmatpush3.bf16.msra.mxu1 %v2887_v46  ;;  %1832 = vmatprep.mubr.f32.mxu1 %v1384_v44 }
 0x312   : > { %2224 = vmatprep.subr.bf16.mxu1 %v2889_v3 }
 0x315   : > { %2226 = vmatpush3.bf16.msra.mxu1 %v2889_v3 }
 0x316   : > { %2228 = vmatprep.subr.bf16.mxu1 %v2894_v16 }
 0x319   : > { %2230 = vmatpush3.bf16.msra.mxu1 %v2894_v16 }
 0x31a   : > { %2232 = vmatprep.subr.bf16.mxu1 %v2898_v51 }
 0x31d   : > { %2234 = vmatpush3.bf16.msra.mxu1 %v2898_v51 }
 0x31e   : > { %2236 = vmatprep.subr.bf16.mxu1 %v2902_v54 }
 0x321   : > { %2238 = vmatpush3.bf16.msra.mxu1 %v2902_v54 }
 0x322   : > { %2240 = vmatprep.subr.bf16.mxu1 %v2906_v57 }
 0x325   : > { %2242 = vmatpush3.bf16.msra.mxu1 %v2906_v57 }
 0x326   : > { %2244 = vmatprep.subr.bf16.mxu1 %v2211_v2 }
 0x329   : > { %2246 = vmatpush3.bf16.msra.mxu1 %v2211_v2 }
 0x32a   : > { %2248 = vmatprep.subr.bf16.mxu1 %v2215_v7 }
 0x32d   : > { %2250 = vmatpush3.bf16.msra.mxu1 %v2215_v7 }
 0x330   : > { %1833 = vmatmul.mubr.f32.vlgmr.msra.gmra.mrb[22].mxu1 %v1385_v63 }
 0x3e3   : > { %v1799_v9 = vpop.f32.mrb[20].mxu1 }
 0x3e4   : > { %v1379_v18 = vadd.f32 %v1799_v9, %v1304_v49  ;;  %v1373_v45 = vpop.f32.mrb[21].mxu1 }
 0x3e5   : > { %v1374_v46 = vadd.f32 %v1373_v45, %v1301_v29 }
 0x3e6   : > { %v1383_v16 = vmax.f32 %v1379_v18, 0.0 }
 0x3e7   : > { %v1382_v33 = vmax.f32 %v1374_v46, 0.0 }
 0x3e8   : > { %vm1462_vm0 = vcmp.gt.f32.partialorder %v1383_v16, 0.0 }
 0x3e9   : > { %vm1461_vm1 = vcmp.gt.f32.partialorder %v1382_v33, 0.0 }
 0x403   : > { %v1834_v47 = vpop.f32.mrb[22].mxu1 }
 0x404   : > { %v1464_v3 = vmax.f32 %v1834_v47, 1e-12  ;;  %v1452_v48 = vpop.f32.mrb[23].mxu1 }
 0x405   : > { %v1463_v50 = vmax.f32 %v1452_v48, 1e-12 }
 0x406   : > { %2361 = vrcp.f32 %v1464_v3 }
 0x407   : > { %2363 = vrcp.f32 %v1463_v50 }
 0x410   : > { %v2362_v28 = vpop.eup %2361 }
 0x411   : > { %v2364_v51 = vpop.eup %2363  ;;  %v1468_v52 = vmul.f32 %v2362_v28, %v1383_v16 }
 0x412   : > { %v1466_v53 = vmul.f32 %v2364_v51, %v1382_v33 }
 0x413   : > { %v1470_v54 = vsel %vm1462_vm0, %v1468_v52, 0.0 }
 0x414   : > { %v1472_v55 = vmul.f32 %v1470_v54, %v1303_v42  ;;  %v1469_v56 = vsel %vm1461_vm1, %v1466_v53, 0.0 }
 0x415   : > { %v1471_v57 = vmul.f32 %v1469_v56, %v1300_v37 }
 0x416   : > { %v1474_v59 = vsub.f32 %v1302_v1, %v1472_v55 }
 0x417   : > { %v1473_v62 = vsub.f32 %v1299_v19, %v1471_v57 }
 0x418   : > { %1476 = vst [vmem:[%s259_s23 + $0x8] sm:$0xff] %v1474_v59 }
 0x419   : > { %1475 = vst [vmem:[%s259_s23] sm:$0xff] %v1473_v62 }
 0x41a   : > { %2492 = shalt.err (!%p2489_p4)
}
 0x41b   : > { %s2493_s29 = scalar_lea.hbm %s2935_s6, 256  ;;  %s2497_s12 = scalar_lea.hbm %s2985_s4, 512 }
 0x41c   : > { %p2494_p9 = scmp.ne.s32.totalorder %s2935_s6, %s2493_s29  ;;  %p2498_p8 = scmp.lt.u32.totalorder %s2935_s6, %s2985_s4 }
 0x41d   : > { %p2499_p13 = scmp.lt.u32.totalorder %s2497_s12, %s2493_s29  ;;  %p2501_p10 = scmp.lt.u32.totalorder %s2493_s29, %s2935_s6 }
 0x41e   : > { %p2495_p0 = pnand %p2494_p9, %p2739_p5 }
 0x41f   : > { %p2500_p6 = por %p2499_p13, %p2498_p8 }
 0x420   : > { %p2496_p11 = pneg %p2495_p0 }
 0x421   : > { %p2502_p3 = por %p2501_p10, %p2500_p6 }
 0x423   : > { %p2503_p7 = pnand %p2502_p3, %p2496_p11 }
 0x425   : > { %2506 = shalt.err (!%p2503_p7)
}
 0x426   : > { %s2567_s21 = smov 128   ;;  %s2568_s23 = smov 8  }
 0x427   : > { %2273 = dma.vmem_to_hbm [thread:$0]  (%p2739_p5), %s2937_s7, 256, %s2935_s6, %s1478_s19, %s2567_s21, %s2567_s21, %s2568_s23  }
 0x428 PF: > { %s1506_s8 = sand.u32 1, %s2541_s15   ;;  %p3003_p12 = scmp.ne.s32.totalorder %s2990_s22, 0 }
 0x429   : > { %p3004_p2 = scmp.ge.s32.totalorder %s2553_s18, 2  ;;  %s1507_s30 = scalar_lea.sflag [#allocation4], %s1506_s8 }
 0x42b   : > { %p2290_p1 = pnand %p3004_p2, %p3003_p12 }
 0x42d   : > { %2536 = dma.done.wait (!%p2290_p1), %s1507_s30, 256  }
 0x42e   : > { %2538 = vsyncadd (!%p2290_p1), %s1507_s30, 4294967040  ;;  %p19_p4 = scmp.ge.s32.totalorder %s2725_s10, 4   ;;  %s3005_s15 = smov %s2545_s16 }
 0x42f   : > { %s3006_s16 = smov %s2549_s17  ;;  %s3007_s17 = smov %s2735_s13 }
 0x430   : > { %s3008_s18 = smov %s2725_s10  ;;  %21 = sbr.rel (!%p19_p4) target bundleno = 7 (0x7), region = 95 }
 0x437   :  { %1512 = vsyncpa [#allocation3], 1 }
 0x438   :  { %1514 = vsyncpa [#allocation3 + $0x1], 1 }
 0x439   :  { %1515 = vsyncpa [#allocation6], 1 }
 0x43a   :  { %1516 = vsyncpa [#allocation9], 1 }
 0x43b   :  { %1517 = vsyncpa [#allocation4], 1 }
 0x43c   :  { %1519 = vsyncpa [#allocation4 + $0x1], 1 }

</bundles_post_ra>
